<compile_context>
chip_gen: v5e
topology: v5e:2x2
jax: 0.10.0
libtpu: 0.0.40
codegen_flags: <defaults>
</compile_context>

<pallas_src>
import jax
import jax.numpy as jnp
from jax.experimental import pallas as pl
from jax.experimental.pallas import tpu as pltpu

# Model hyper-parameters (torch.nn.Conv2d(3, 4, 2, stride=1, padding=2, dilation=3))
C_IN, C_OUT = 3, 4
KH, KW = 2, 2
STRIDE, PAD, DIL = 1, 2, 3
K = C_IN * KH * KW  # 12 im2col planes


def _make_kernel(h_out, w_out):
    def kernel(xpad_ref, w_ref, b_ref, out_ref):
        # xpad_ref: (C_IN, H+2P, W+2P) f32 VMEM  zero-padded input image
        # w_ref   : (C_OUT*K,)         f32 SMEM  conv weights, c-major / (ci,kh,kw)-minor
        # b_ref   : (C_OUT,)           f32 SMEM  conv bias
        # out_ref : (1, 1)             f32 SMEM  final scalar

        # Loop-invariant index / sentinel planes (hoisted: JAX does not CSE broadcasts).
        wid = jax.lax.broadcasted_iota(jnp.int32, (h_out, w_out), 1)
        sentinel = jnp.full((h_out, w_out), w_out, jnp.int32)

        # Conv on the VPU: k-outer, 4 per-channel accumulators.  Each im2col plane
        # is a static shifted slice of the padded image, read exactly once and
        # live only for this k step.
        acc = [jnp.full((h_out, w_out), b_ref[c], jnp.float32) for c in range(C_OUT)]
        for ci in range(C_IN):
            for kh in range(KH):
                for kw in range(KW):
                    k = (ci * KH + kh) * KW + kw
                    plane = xpad_ref[ci,
                                     kh * DIL:kh * DIL + h_out,
                                     kw * DIL:kw * DIL + w_out]
                    for c in range(C_OUT):
                        acc[c] = acc[c] + w_ref[c * K + k] * plane

        # argmax over W (torch dim=3, first occurrence on ties), then running
        # argmin over channels (torch dim=2 after unsqueeze(0), first occurrence).
        # Dead exp/+3/*13/clamp/div chain removed: v6 = v1/12 shares v1's argmax.
        best_idx = None   # running min over channels of the per-row argmax index
        best_c = None     # its (first-occurrence) channel index
        for c in range(C_OUT):
            v1 = acc[c]
            row_max = jnp.max(v1, axis=1, keepdims=True)
            amax = jnp.min(jnp.where(v1 == row_max, wid, sentinel),
                           axis=1, keepdims=True)               # (h_out, 1) int32
            if c == 0:
                best_idx = amax
                best_c = jnp.zeros_like(amax)
            else:
                take = amax < best_idx                          # strict: keep earlier channel
                best_c = jnp.where(take, c, best_c)
                best_idx = jnp.where(take, amax, best_idx)

        # v11 = 21821 * argmin ;  v13 = sqrt((sum v11)^2) == sum v11  (>= 0, exact)
        out_ref[0, 0] = jnp.sum(best_c * 21821).astype(jnp.float32)

    return kernel


def model_forward(x, weight, bias):
    """x: (1, C_IN, H, W) float32 (NCHW, like PyTorch). Returns scalar float32."""
    n, cin, h_in, w_in = x.shape
    assert n == 1 and cin == C_IN
    h_out = (h_in + 2 * PAD - DIL * (KH - 1) - 1) // STRIDE + 1
    w_out = (w_in + 2 * PAD - DIL * (KW - 1) - 1) // STRIDE + 1

    # Only remaining glue: zero-pad the tiny image (a few KB); im2col happens in-kernel.
    xpad = jnp.pad(x[0].astype(jnp.float32), ((0, 0), (PAD, PAD), (PAD, PAD)))
    wflat = weight.reshape(C_OUT * K).astype(jnp.float32)   # ((c*C_IN+ci)*KH+kh)*KW+kw order
    bflat = bias.reshape(C_OUT).astype(jnp.float32)

    out = pl.pallas_call(
        _make_kernel(h_out, w_out),
        out_shape=jax.ShapeDtypeStruct((1, 1), jnp.float32),
        in_specs=[
            pl.BlockSpec(memory_space=pltpu.MemorySpace.VMEM),   # padded image
            pl.BlockSpec(memory_space=pltpu.MemorySpace.SMEM),   # weight scalars
            pl.BlockSpec(memory_space=pltpu.MemorySpace.SMEM),   # bias scalars
        ],
        out_specs=pl.BlockSpec(memory_space=pltpu.MemorySpace.SMEM),
    )(xpad, wflat, bflat)
    return out[0, 0]


if __name__ == "__main__":
    key = jax.random.PRNGKey(0)
    kx, kw_, kb = jax.random.split(key, 3)

    # small input consistent with the module: batch=1 (batch=3 is inconsistent in
    # the original torch forward), channels=3, spatial=16
    x = jax.random.normal(kx, (1, C_IN, 16, 16), jnp.float32)

    # deterministic Conv2d-style init: U(-1/sqrt(fan_in), 1/sqrt(fan_in))
    fan_in = C_IN * KH * KW
    bound = 1.0 / (fan_in ** 0.5)
    weight = jax.random.uniform(kw_, (C_OUT, C_IN, KH, KW), jnp.float32, -bound, bound)
    bias = jax.random.uniform(kb, (C_OUT,), jnp.float32, -bound, bound)

    fwd = jax.jit(model_forward)          # pad fused with the single pallas_call launch
    y = fwd(x, weight, bias)
    jax.block_until_ready(y)
    print("KERNEL_OK")
</pallas_src>

<mosaic_0001>
module attributes {stable_mosaic.version = 11 : i64} {
  func.func @kernel(%arg0: memref<3x20x20xf32, #tpu.memory_space<vmem>>, %arg1: memref<48xf32, #tpu.memory_space<smem>>, %arg2: memref<4xf32, #tpu.memory_space<smem>>, %arg3: memref<1x1xf32, #tpu.memory_space<smem>>) attributes {dimension_semantics = [], scalar_prefetch = 0 : i64, scratch_operands = 0 : i64, tpu.core_type = #tpu.core_type<tc>} {
    %0 = tpu.iota {dimensions = array<i32: 1>} : vector<17x17xi32>
    %c17_i32 = arith.constant 17 : i32
    %1 = vector.broadcast %c17_i32 : i32 to vector<17x17xi32>
    %c0 = arith.constant 0 : index
    %2 = memref.load %arg2[%c0] : memref<4xf32, #tpu.memory_space<smem>>
    %3 = vector.broadcast %2 : f32 to vector<17x17xf32>
    %c1 = arith.constant 1 : index
    %4 = memref.load %arg2[%c1] : memref<4xf32, #tpu.memory_space<smem>>
    %5 = vector.broadcast %4 : f32 to vector<17x17xf32>
    %c2 = arith.constant 2 : index
    %6 = memref.load %arg2[%c2] : memref<4xf32, #tpu.memory_space<smem>>
    %7 = vector.broadcast %6 : f32 to vector<17x17xf32>
    %c3 = arith.constant 3 : index
    %8 = memref.load %arg2[%c3] : memref<4xf32, #tpu.memory_space<smem>>
    %9 = vector.broadcast %8 : f32 to vector<17x17xf32>
    %c0_0 = arith.constant 0 : index
    %c0_1 = arith.constant 0 : index
    %c0_2 = arith.constant 0 : index
    %10 = vector.load %arg0[%c0_0, %c0_1, %c0_2] : memref<3x20x20xf32, #tpu.memory_space<vmem>>, vector<1x17x17xf32>
    %11 = vector.shape_cast %10 : vector<1x17x17xf32> to vector<17x17xf32>
    %c0_3 = arith.constant 0 : index
    %12 = memref.load %arg1[%c0_3] : memref<48xf32, #tpu.memory_space<smem>>
    %13 = vector.broadcast %12 : f32 to vector<17x17xf32>
    %14 = arith.mulf %13, %11 : vector<17x17xf32>
    %15 = arith.addf %3, %14 : vector<17x17xf32>
    %c12 = arith.constant 12 : index
    %16 = memref.load %arg1[%c12] : memref<48xf32, #tpu.memory_space<smem>>
    %17 = vector.broadcast %16 : f32 to vector<17x17xf32>
    %18 = arith.mulf %17, %11 : vector<17x17xf32>
    %19 = arith.addf %5, %18 : vector<17x17xf32>
    %c24 = arith.constant 24 : index
    %20 = memref.load %arg1[%c24] : memref<48xf32, #tpu.memory_space<smem>>
    %21 = vector.broadcast %20 : f32 to vector<17x17xf32>
    %22 = arith.mulf %21, %11 : vector<17x17xf32>
    %23 = arith.addf %7, %22 : vector<17x17xf32>
    %c36 = arith.constant 36 : index
    %24 = memref.load %arg1[%c36] : memref<48xf32, #tpu.memory_space<smem>>
    %25 = vector.broadcast %24 : f32 to vector<17x17xf32>
    %26 = arith.mulf %25, %11 : vector<17x17xf32>
    %27 = arith.addf %9, %26 : vector<17x17xf32>
    %c0_4 = arith.constant 0 : index
    %c0_5 = arith.constant 0 : index
    %c3_6 = arith.constant 3 : index
    %28 = vector.load %arg0[%c0_4, %c0_5, %c3_6] : memref<3x20x20xf32, #tpu.memory_space<vmem>>, vector<1x17x17xf32>
    %29 = vector.shape_cast %28 : vector<1x17x17xf32> to vector<17x17xf32>
    %c1_7 = arith.constant 1 : index
    %30 = memref.load %arg1[%c1_7] : memref<48xf32, #tpu.memory_space<smem>>
    %31 = vector.broadcast %30 : f32 to vector<17x17xf32>
    %32 = arith.mulf %31, %29 : vector<17x17xf32>
    %33 = arith.addf %15, %32 : vector<17x17xf32>
    %c13 = arith.constant 13 : index
    %34 = memref.load %arg1[%c13] : memref<48xf32, #tpu.memory_space<smem>>
    %35 = vector.broadcast %34 : f32 to vector<17x17xf32>
    %36 = arith.mulf %35, %29 : vector<17x17xf32>
    %37 = arith.addf %19, %36 : vector<17x17xf32>
    %c25 = arith.constant 25 : index
    %38 = memref.load %arg1[%c25] : memref<48xf32, #tpu.memory_space<smem>>
    %39 = vector.broadcast %38 : f32 to vector<17x17xf32>
    %40 = arith.mulf %39, %29 : vector<17x17xf32>
    %41 = arith.addf %23, %40 : vector<17x17xf32>
    %c37 = arith.constant 37 : index
    %42 = memref.load %arg1[%c37] : memref<48xf32, #tpu.memory_space<smem>>
    %43 = vector.broadcast %42 : f32 to vector<17x17xf32>
    %44 = arith.mulf %43, %29 : vector<17x17xf32>
    %45 = arith.addf %27, %44 : vector<17x17xf32>
    %c0_8 = arith.constant 0 : index
    %c3_9 = arith.constant 3 : index
    %c0_10 = arith.constant 0 : index
    %46 = vector.load %arg0[%c0_8, %c3_9, %c0_10] : memref<3x20x20xf32, #tpu.memory_space<vmem>>, vector<1x17x17xf32>
    %47 = vector.shape_cast %46 : vector<1x17x17xf32> to vector<17x17xf32>
    %c2_11 = arith.constant 2 : index
    %48 = memref.load %arg1[%c2_11] : memref<48xf32, #tpu.memory_space<smem>>
    %49 = vector.broadcast %48 : f32 to vector<17x17xf32>
    %50 = arith.mulf %49, %47 : vector<17x17xf32>
    %51 = arith.addf %33, %50 : vector<17x17xf32>
    %c14 = arith.constant 14 : index
    %52 = memref.load %arg1[%c14] : memref<48xf32, #tpu.memory_space<smem>>
    %53 = vector.broadcast %52 : f32 to vector<17x17xf32>
    %54 = arith.mulf %53, %47 : vector<17x17xf32>
    %55 = arith.addf %37, %54 : vector<17x17xf32>
    %c26 = arith.constant 26 : index
    %56 = memref.load %arg1[%c26] : memref<48xf32, #tpu.memory_space<smem>>
    %57 = vector.broadcast %56 : f32 to vector<17x17xf32>
    %58 = arith.mulf %57, %47 : vector<17x17xf32>
    %59 = arith.addf %41, %58 : vector<17x17xf32>
    %c38 = arith.constant 38 : index
    %60 = memref.load %arg1[%c38] : memref<48xf32, #tpu.memory_space<smem>>
    %61 = vector.broadcast %60 : f32 to vector<17x17xf32>
    %62 = arith.mulf %61, %47 : vector<17x17xf32>
    %63 = arith.addf %45, %62 : vector<17x17xf32>
    %c0_12 = arith.constant 0 : index
    %c3_13 = arith.constant 3 : index
    %c3_14 = arith.constant 3 : index
    %64 = vector.load %arg0[%c0_12, %c3_13, %c3_14] : memref<3x20x20xf32, #tpu.memory_space<vmem>>, vector<1x17x17xf32>
    %65 = vector.shape_cast %64 : vector<1x17x17xf32> to vector<17x17xf32>
    %c3_15 = arith.constant 3 : index
    %66 = memref.load %arg1[%c3_15] : memref<48xf32, #tpu.memory_space<smem>>
    %67 = vector.broadcast %66 : f32 to vector<17x17xf32>
    %68 = arith.mulf %67, %65 : vector<17x17xf32>
    %69 = arith.addf %51, %68 : vector<17x17xf32>
    %c15 = arith.constant 15 : index
    %70 = memref.load %arg1[%c15] : memref<48xf32, #tpu.memory_space<smem>>
    %71 = vector.broadcast %70 : f32 to vector<17x17xf32>
    %72 = arith.mulf %71, %65 : vector<17x17xf32>
    %73 = arith.addf %55, %72 : vector<17x17xf32>
    %c27 = arith.constant 27 : index
    %74 = memref.load %arg1[%c27] : memref<48xf32, #tpu.memory_space<smem>>
    %75 = vector.broadcast %74 : f32 to vector<17x17xf32>
    %76 = arith.mulf %75, %65 : vector<17x17xf32>
    %77 = arith.addf %59, %76 : vector<17x17xf32>
    %c39 = arith.constant 39 : index
    %78 = memref.load %arg1[%c39] : memref<48xf32, #tpu.memory_space<smem>>
    %79 = vector.broadcast %78 : f32 to vector<17x17xf32>
    %80 = arith.mulf %79, %65 : vector<17x17xf32>
    %81 = arith.addf %63, %80 : vector<17x17xf32>
    %c1_16 = arith.constant 1 : index
    %c0_17 = arith.constant 0 : index
    %c0_18 = arith.constant 0 : index
    %82 = vector.load %arg0[%c1_16, %c0_17, %c0_18] : memref<3x20x20xf32, #tpu.memory_space<vmem>>, vector<1x17x17xf32>
    %83 = vector.shape_cast %82 : vector<1x17x17xf32> to vector<17x17xf32>
    %c4 = arith.constant 4 : index
    %84 = memref.load %arg1[%c4] : memref<48xf32, #tpu.memory_space<smem>>
    %85 = vector.broadcast %84 : f32 to vector<17x17xf32>
    %86 = arith.mulf %85, %83 : vector<17x17xf32>
    %87 = arith.addf %69, %86 : vector<17x17xf32>
    %c16 = arith.constant 16 : index
    %88 = memref.load %arg1[%c16] : memref<48xf32, #tpu.memory_space<smem>>
    %89 = vector.broadcast %88 : f32 to vector<17x17xf32>
    %90 = arith.mulf %89, %83 : vector<17x17xf32>
    %91 = arith.addf %73, %90 : vector<17x17xf32>
    %c28 = arith.constant 28 : index
    %92 = memref.load %arg1[%c28] : memref<48xf32, #tpu.memory_space<smem>>
    %93 = vector.broadcast %92 : f32 to vector<17x17xf32>
    %94 = arith.mulf %93, %83 : vector<17x17xf32>
    %95 = arith.addf %77, %94 : vector<17x17xf32>
    %c40 = arith.constant 40 : index
    %96 = memref.load %arg1[%c40] : memref<48xf32, #tpu.memory_space<smem>>
    %97 = vector.broadcast %96 : f32 to vector<17x17xf32>
    %98 = arith.mulf %97, %83 : vector<17x17xf32>
    %99 = arith.addf %81, %98 : vector<17x17xf32>
    %c1_19 = arith.constant 1 : index
    %c0_20 = arith.constant 0 : index
    %c3_21 = arith.constant 3 : index
    %100 = vector.load %arg0[%c1_19, %c0_20, %c3_21] : memref<3x20x20xf32, #tpu.memory_space<vmem>>, vector<1x17x17xf32>
    %101 = vector.shape_cast %100 : vector<1x17x17xf32> to vector<17x17xf32>
    %c5 = arith.constant 5 : index
    %102 = memref.load %arg1[%c5] : memref<48xf32, #tpu.memory_space<smem>>
    %103 = vector.broadcast %102 : f32 to vector<17x17xf32>
    %104 = arith.mulf %103, %101 : vector<17x17xf32>
    %105 = arith.addf %87, %104 : vector<17x17xf32>
    %c17 = arith.constant 17 : index
    %106 = memref.load %arg1[%c17] : memref<48xf32, #tpu.memory_space<smem>>
    %107 = vector.broadcast %106 : f32 to vector<17x17xf32>
    %108 = arith.mulf %107, %101 : vector<17x17xf32>
    %109 = arith.addf %91, %108 : vector<17x17xf32>
    %c29 = arith.constant 29 : index
    %110 = memref.load %arg1[%c29] : memref<48xf32, #tpu.memory_space<smem>>
    %111 = vector.broadcast %110 : f32 to vector<17x17xf32>
    %112 = arith.mulf %111, %101 : vector<17x17xf32>
    %113 = arith.addf %95, %112 : vector<17x17xf32>
    %c41 = arith.constant 41 : index
    %114 = memref.load %arg1[%c41] : memref<48xf32, #tpu.memory_space<smem>>
    %115 = vector.broadcast %114 : f32 to vector<17x17xf32>
    %116 = arith.mulf %115, %101 : vector<17x17xf32>
    %117 = arith.addf %99, %116 : vector<17x17xf32>
    %c1_22 = arith.constant 1 : index
    %c3_23 = arith.constant 3 : index
    %c0_24 = arith.constant 0 : index
    %118 = vector.load %arg0[%c1_22, %c3_23, %c0_24] : memref<3x20x20xf32, #tpu.memory_space<vmem>>, vector<1x17x17xf32>
    %119 = vector.shape_cast %118 : vector<1x17x17xf32> to vector<17x17xf32>
    %c6 = arith.constant 6 : index
    %120 = memref.load %arg1[%c6] : memref<48xf32, #tpu.memory_space<smem>>
    %121 = vector.broadcast %120 : f32 to vector<17x17xf32>
    %122 = arith.mulf %121, %119 : vector<17x17xf32>
    %123 = arith.addf %105, %122 : vector<17x17xf32>
    %c18 = arith.constant 18 : index
    %124 = memref.load %arg1[%c18] : memref<48xf32, #tpu.memory_space<smem>>
    %125 = vector.broadcast %124 : f32 to vector<17x17xf32>
    %126 = arith.mulf %125, %119 : vector<17x17xf32>
    %127 = arith.addf %109, %126 : vector<17x17xf32>
    %c30 = arith.constant 30 : index
    %128 = memref.load %arg1[%c30] : memref<48xf32, #tpu.memory_space<smem>>
    %129 = vector.broadcast %128 : f32 to vector<17x17xf32>
    %130 = arith.mulf %129, %119 : vector<17x17xf32>
    %131 = arith.addf %113, %130 : vector<17x17xf32>
    %c42 = arith.constant 42 : index
    %132 = memref.load %arg1[%c42] : memref<48xf32, #tpu.memory_space<smem>>
    %133 = vector.broadcast %132 : f32 to vector<17x17xf32>
    %134 = arith.mulf %133, %119 : vector<17x17xf32>
    %135 = arith.addf %117, %134 : vector<17x17xf32>
    %c1_25 = arith.constant 1 : index
    %c3_26 = arith.constant 3 : index
    %c3_27 = arith.constant 3 : index
    %136 = vector.load %arg0[%c1_25, %c3_26, %c3_27] : memref<3x20x20xf32, #tpu.memory_space<vmem>>, vector<1x17x17xf32>
    %137 = vector.shape_cast %136 : vector<1x17x17xf32> to vector<17x17xf32>
    %c7 = arith.constant 7 : index
    %138 = memref.load %arg1[%c7] : memref<48xf32, #tpu.memory_space<smem>>
    %139 = vector.broadcast %138 : f32 to vector<17x17xf32>
    %140 = arith.mulf %139, %137 : vector<17x17xf32>
    %141 = arith.addf %123, %140 : vector<17x17xf32>
    %c19 = arith.constant 19 : index
    %142 = memref.load %arg1[%c19] : memref<48xf32, #tpu.memory_space<smem>>
    %143 = vector.broadcast %142 : f32 to vector<17x17xf32>
    %144 = arith.mulf %143, %137 : vector<17x17xf32>
    %145 = arith.addf %127, %144 : vector<17x17xf32>
    %c31 = arith.constant 31 : index
    %146 = memref.load %arg1[%c31] : memref<48xf32, #tpu.memory_space<smem>>
    %147 = vector.broadcast %146 : f32 to vector<17x17xf32>
    %148 = arith.mulf %147, %137 : vector<17x17xf32>
    %149 = arith.addf %131, %148 : vector<17x17xf32>
    %c43 = arith.constant 43 : index
    %150 = memref.load %arg1[%c43] : memref<48xf32, #tpu.memory_space<smem>>
    %151 = vector.broadcast %150 : f32 to vector<17x17xf32>
    %152 = arith.mulf %151, %137 : vector<17x17xf32>
    %153 = arith.addf %135, %152 : vector<17x17xf32>
    %c2_28 = arith.constant 2 : index
    %c0_29 = arith.constant 0 : index
    %c0_30 = arith.constant 0 : index
    %154 = vector.load %arg0[%c2_28, %c0_29, %c0_30] : memref<3x20x20xf32, #tpu.memory_space<vmem>>, vector<1x17x17xf32>
    %155 = vector.shape_cast %154 : vector<1x17x17xf32> to vector<17x17xf32>
    %c8 = arith.constant 8 : index
    %156 = memref.load %arg1[%c8] : memref<48xf32, #tpu.memory_space<smem>>
    %157 = vector.broadcast %156 : f32 to vector<17x17xf32>
    %158 = arith.mulf %157, %155 : vector<17x17xf32>
    %159 = arith.addf %141, %158 : vector<17x17xf32>
    %c20 = arith.constant 20 : index
    %160 = memref.load %arg1[%c20] : memref<48xf32, #tpu.memory_space<smem>>
    %161 = vector.broadcast %160 : f32 to vector<17x17xf32>
    %162 = arith.mulf %161, %155 : vector<17x17xf32>
    %163 = arith.addf %145, %162 : vector<17x17xf32>
    %c32 = arith.constant 32 : index
    %164 = memref.load %arg1[%c32] : memref<48xf32, #tpu.memory_space<smem>>
    %165 = vector.broadcast %164 : f32 to vector<17x17xf32>
    %166 = arith.mulf %165, %155 : vector<17x17xf32>
    %167 = arith.addf %149, %166 : vector<17x17xf32>
    %c44 = arith.constant 44 : index
    %168 = memref.load %arg1[%c44] : memref<48xf32, #tpu.memory_space<smem>>
    %169 = vector.broadcast %168 : f32 to vector<17x17xf32>
    %170 = arith.mulf %169, %155 : vector<17x17xf32>
    %171 = arith.addf %153, %170 : vector<17x17xf32>
    %c2_31 = arith.constant 2 : index
    %c0_32 = arith.constant 0 : index
    %c3_33 = arith.constant 3 : index
    %172 = vector.load %arg0[%c2_31, %c0_32, %c3_33] : memref<3x20x20xf32, #tpu.memory_space<vmem>>, vector<1x17x17xf32>
    %173 = vector.shape_cast %172 : vector<1x17x17xf32> to vector<17x17xf32>
    %c9 = arith.constant 9 : index
    %174 = memref.load %arg1[%c9] : memref<48xf32, #tpu.memory_space<smem>>
    %175 = vector.broadcast %174 : f32 to vector<17x17xf32>
    %176 = arith.mulf %175, %173 : vector<17x17xf32>
    %177 = arith.addf %159, %176 : vector<17x17xf32>
    %c21 = arith.constant 21 : index
    %178 = memref.load %arg1[%c21] : memref<48xf32, #tpu.memory_space<smem>>
    %179 = vector.broadcast %178 : f32 to vector<17x17xf32>
    %180 = arith.mulf %179, %173 : vector<17x17xf32>
    %181 = arith.addf %163, %180 : vector<17x17xf32>
    %c33 = arith.constant 33 : index
    %182 = memref.load %arg1[%c33] : memref<48xf32, #tpu.memory_space<smem>>
    %183 = vector.broadcast %182 : f32 to vector<17x17xf32>
    %184 = arith.mulf %183, %173 : vector<17x17xf32>
    %185 = arith.addf %167, %184 : vector<17x17xf32>
    %c45 = arith.constant 45 : index
    %186 = memref.load %arg1[%c45] : memref<48xf32, #tpu.memory_space<smem>>
    %187 = vector.broadcast %186 : f32 to vector<17x17xf32>
    %188 = arith.mulf %187, %173 : vector<17x17xf32>
    %189 = arith.addf %171, %188 : vector<17x17xf32>
    %c2_34 = arith.constant 2 : index
    %c3_35 = arith.constant 3 : index
    %c0_36 = arith.constant 0 : index
    %190 = vector.load %arg0[%c2_34, %c3_35, %c0_36] : memref<3x20x20xf32, #tpu.memory_space<vmem>>, vector<1x17x17xf32>
    %191 = vector.shape_cast %190 : vector<1x17x17xf32> to vector<17x17xf32>
    %c10 = arith.constant 10 : index
    %192 = memref.load %arg1[%c10] : memref<48xf32, #tpu.memory_space<smem>>
    %193 = vector.broadcast %192 : f32 to vector<17x17xf32>
    %194 = arith.mulf %193, %191 : vector<17x17xf32>
    %195 = arith.addf %177, %194 : vector<17x17xf32>
    %c22 = arith.constant 22 : index
    %196 = memref.load %arg1[%c22] : memref<48xf32, #tpu.memory_space<smem>>
    %197 = vector.broadcast %196 : f32 to vector<17x17xf32>
    %198 = arith.mulf %197, %191 : vector<17x17xf32>
    %199 = arith.addf %181, %198 : vector<17x17xf32>
    %c34 = arith.constant 34 : index
    %200 = memref.load %arg1[%c34] : memref<48xf32, #tpu.memory_space<smem>>
    %201 = vector.broadcast %200 : f32 to vector<17x17xf32>
    %202 = arith.mulf %201, %191 : vector<17x17xf32>
    %203 = arith.addf %185, %202 : vector<17x17xf32>
    %c46 = arith.constant 46 : index
    %204 = memref.load %arg1[%c46] : memref<48xf32, #tpu.memory_space<smem>>
    %205 = vector.broadcast %204 : f32 to vector<17x17xf32>
    %206 = arith.mulf %205, %191 : vector<17x17xf32>
    %207 = arith.addf %189, %206 : vector<17x17xf32>
    %c2_37 = arith.constant 2 : index
    %c3_38 = arith.constant 3 : index
    %c3_39 = arith.constant 3 : index
    %208 = vector.load %arg0[%c2_37, %c3_38, %c3_39] : memref<3x20x20xf32, #tpu.memory_space<vmem>>, vector<1x17x17xf32>
    %209 = vector.shape_cast %208 : vector<1x17x17xf32> to vector<17x17xf32>
    %c11 = arith.constant 11 : index
    %210 = memref.load %arg1[%c11] : memref<48xf32, #tpu.memory_space<smem>>
    %211 = vector.broadcast %210 : f32 to vector<17x17xf32>
    %212 = arith.mulf %211, %209 : vector<17x17xf32>
    %213 = arith.addf %195, %212 : vector<17x17xf32>
    %c23 = arith.constant 23 : index
    %214 = memref.load %arg1[%c23] : memref<48xf32, #tpu.memory_space<smem>>
    %215 = vector.broadcast %214 : f32 to vector<17x17xf32>
    %216 = arith.mulf %215, %209 : vector<17x17xf32>
    %217 = arith.addf %199, %216 : vector<17x17xf32>
    %c35 = arith.constant 35 : index
    %218 = memref.load %arg1[%c35] : memref<48xf32, #tpu.memory_space<smem>>
    %219 = vector.broadcast %218 : f32 to vector<17x17xf32>
    %220 = arith.mulf %219, %209 : vector<17x17xf32>
    %221 = arith.addf %203, %220 : vector<17x17xf32>
    %c47 = arith.constant 47 : index
    %222 = memref.load %arg1[%c47] : memref<48xf32, #tpu.memory_space<smem>>
    %223 = vector.broadcast %222 : f32 to vector<17x17xf32>
    %224 = arith.mulf %223, %209 : vector<17x17xf32>
    %225 = arith.addf %207, %224 : vector<17x17xf32>
    %cst = arith.constant dense<0xFF800000> : vector<17xf32>
    %226 = vector.multi_reduction <maximumf>, %213, %cst [1] : vector<17x17xf32> to vector<17xf32>
    %227 = vector.shape_cast %226 : vector<17xf32> to vector<17x1xf32>
    %228 = vector.broadcast %227 : vector<17x1xf32> to vector<17x17xf32>
    %229 = arith.cmpf oeq, %213, %228 : vector<17x17xf32>
    %230 = arith.select %229, %0, %1 : vector<17x17xi1>, vector<17x17xi32>
    %cst_40 = arith.constant dense<2147483647> : vector<17xi32>
    %231 = vector.multi_reduction <minsi>, %230, %cst_40 [1] : vector<17x17xi32> to vector<17xi32>
    %232 = vector.shape_cast %231 : vector<17xi32> to vector<17x1xi32>
    %c0_i32 = arith.constant 0 : i32
    %233 = vector.broadcast %c0_i32 : i32 to vector<17x1xi32>
    %cst_41 = arith.constant dense<0xFF800000> : vector<17xf32>
    %234 = vector.multi_reduction <maximumf>, %217, %cst_41 [1] : vector<17x17xf32> to vector<17xf32>
    %235 = vector.shape_cast %234 : vector<17xf32> to vector<17x1xf32>
    %236 = vector.broadcast %235 : vector<17x1xf32> to vector<17x17xf32>
    %237 = arith.cmpf oeq, %217, %236 : vector<17x17xf32>
    %238 = arith.select %237, %0, %1 : vector<17x17xi1>, vector<17x17xi32>
    %cst_42 = arith.constant dense<2147483647> : vector<17xi32>
    %239 = vector.multi_reduction <minsi>, %238, %cst_42 [1] : vector<17x17xi32> to vector<17xi32>
    %240 = vector.shape_cast %239 : vector<17xi32> to vector<17x1xi32>
    %241 = arith.cmpi slt, %240, %232 : vector<17x1xi32>
    %c1_i32 = arith.constant 1 : i32
    %242 = vector.broadcast %c1_i32 : i32 to vector<17x1xi32>
    %243 = arith.select %241, %242, %233 : vector<17x1xi1>, vector<17x1xi32>
    %244 = arith.select %241, %240, %232 : vector<17x1xi1>, vector<17x1xi32>
    %cst_43 = arith.constant dense<0xFF800000> : vector<17xf32>
    %245 = vector.multi_reduction <maximumf>, %221, %cst_43 [1] : vector<17x17xf32> to vector<17xf32>
    %246 = vector.shape_cast %245 : vector<17xf32> to vector<17x1xf32>
    %247 = vector.broadcast %246 : vector<17x1xf32> to vector<17x17xf32>
    %248 = arith.cmpf oeq, %221, %247 : vector<17x17xf32>
    %249 = arith.select %248, %0, %1 : vector<17x17xi1>, vector<17x17xi32>
    %cst_44 = arith.constant dense<2147483647> : vector<17xi32>
    %250 = vector.multi_reduction <minsi>, %249, %cst_44 [1] : vector<17x17xi32> to vector<17xi32>
    %251 = vector.shape_cast %250 : vector<17xi32> to vector<17x1xi32>
    %252 = arith.cmpi slt, %251, %244 : vector<17x1xi32>
    %c2_i32 = arith.constant 2 : i32
    %253 = vector.broadcast %c2_i32 : i32 to vector<17x1xi32>
    %254 = arith.select %252, %253, %243 : vector<17x1xi1>, vector<17x1xi32>
    %255 = arith.select %252, %251, %244 : vector<17x1xi1>, vector<17x1xi32>
    %cst_45 = arith.constant dense<0xFF800000> : vector<17xf32>
    %256 = vector.multi_reduction <maximumf>, %225, %cst_45 [1] : vector<17x17xf32> to vector<17xf32>
    %257 = vector.shape_cast %256 : vector<17xf32> to vector<17x1xf32>
    %258 = vector.broadcast %257 : vector<17x1xf32> to vector<17x17xf32>
    %259 = arith.cmpf oeq, %225, %258 : vector<17x17xf32>
    %260 = arith.select %259, %0, %1 : vector<17x17xi1>, vector<17x17xi32>
    %cst_46 = arith.constant dense<2147483647> : vector<17xi32>
    %261 = vector.multi_reduction <minsi>, %260, %cst_46 [1] : vector<17x17xi32> to vector<17xi32>
    %262 = vector.shape_cast %261 : vector<17xi32> to vector<17x1xi32>
    %263 = arith.cmpi slt, %262, %255 : vector<17x1xi32>
    %c3_i32 = arith.constant 3 : i32
    %264 = vector.broadcast %c3_i32 : i32 to vector<17x1xi32>
    %265 = arith.select %263, %264, %254 : vector<17x1xi1>, vector<17x1xi32>
    %c21821_i32 = arith.constant 21821 : i32
    %266 = vector.broadcast %c21821_i32 : i32 to vector<17x1xi32>
    %267 = arith.muli %265, %266 : vector<17x1xi32>
    %268 = vector.shape_cast %267 : vector<17x1xi32> to vector<1x17x1xi32>
    %cst_47 = arith.constant dense<0> : vector<1xi32>
    %269 = vector.multi_reduction <add>, %268, %cst_47 [1, 2] : vector<1x17x1xi32> to vector<1xi32>
    %270 = vector.shape_cast %269 : vector<1xi32> to vector<1x1x1xi32>
    %271 = vector.extract %270[0, 0, 0] : i32 from vector<1x1x1xi32>
    %272 = arith.sitofp %271 : i32 to f32
    %c0_48 = arith.constant 0 : index
    %c0_49 = arith.constant 0 : index
    %273 = memref.load %arg3[%c0_48, %c0_49] : memref<1x1xf32, #tpu.memory_space<smem>>
    memref.store %272, %arg3[%c0_48, %c0_49] : memref<1x1xf32, #tpu.memory_space<smem>>
    return
  }
}

</mosaic_0001>

<bundles_post_ra>
// kernel: model_forward.1
= control target key start
LH: loop header
LB: loop body
LE: loop exit
PB: predicated region body
PF: predicated region fallthrough
CT: control target
= control target key end

     0   :  { %8 = vsyncpa [#allocation4], 0  ;;  %s1966_s0 = inlined_call_operand.vmem [shape: f32[3,20,20], index: 0, kind: input, shape index: {}]   ;;  %s1967_s1 = inlined_call_operand.vmem [shape: f32[48], index: 1, kind: input, shape index: {}]   ;;  %s1968_s2 = inlined_call_operand.vmem [shape: f32[4], index: 2, kind: input, shape index: {}]   ;;  %s1969_s3 = inlined_call_operand.hbm [shape: f32[1,1], index: 3, kind: output, shape index: {}]  }
   0x1   :  { %9 = vsyncpa [#allocation6], 0 }
   0x2   :  { %10 = vsyncpa [#allocation3], 0  ;;  %s18_s14 = sshll.u32 %s1967_s1, 4  ;;  %s27_s17 = sshll.u32 %s1968_s2, 4  ;;  %s19_s14 = int_to_ptr.vmem [resolvable:$true] %s18_s14  ;;  %s28_s17 = int_to_ptr.vmem [resolvable:$true] %s27_s17 }
   0x3   :  { %s1153_s18 = smov [#allocation2]   ;;  %s1154_s19 = smov [#allocation5]  }
   0x4   :  { %21 = dma.vmem_to_smem %s19_s14, 16, %s1153_s18, [#allocation4]  }
   0x5   :  { %30 = dma.vmem_to_smem %s28_s17, 16, %s1154_s19, [#allocation6]  }
   0x6   :  { %1147 = dma.done.wait [#allocation4], 16  }
   0x7   :  { %1148 = vsyncadd [#allocation4], 4294967280 }
   0x8   :  { %1149 = dma.done.wait [#allocation6], 16  }
   0x9   :  { %1150 = vsyncadd [#allocation6], 4294967280 }
   0xa   :  { %39 = sfence }
   0xb   :  { %s1048_s20 = sld [smem:[#allocation2 + $0x1]]  ;;  %v1187_v0 = vld [vmem:[%s1966_s0 + $0x10] sm:$0x1]  ;;  %v1192_v1 = vld [vmem:[%s1966_s0] sm:$0xff]  ;;  %v1197_v2 = vld [vmem:[%s1966_s0 + $0x8] sm:$0xff]  ;;  %s1155_s26 = smov 125  }
   0xc   :  { %s1049_s21 = sld [smem:[#allocation2 + $0xd]]  ;;  %v1226_v20 = vld [vmem:[%s1966_s0 + $0xb] sm:$0xff]  ;;  %v1231_v21 = vld [vmem:[%s1966_s0 + $0x3] sm:$0xff]  ;;  %v1236_v22 = vld [vmem:[%s1966_s0 + $0x13] sm:$0x1]  ;;  %vm742_vm0 = vcmask 138240  }
   0xd   :  { %s1050_s27 = sld [smem:[#allocation2 + $0x19]]  ;;  %v1265_v38 = vld [vmem:[%s1966_s0 + $0x18] sm:$0xff]  ;;  %v1270_v39 = vld [vmem:[%s1966_s0 + $0x20] sm:$0xff]  ;;  %v1281_v45 = vld [vmem:[%s1966_s0 + $0x28] sm:$0x1]  ;;  %vm749_vm1 = vcmask 131072  }
   0xe   :  { %s1051_s28 = sld [smem:[#allocation2 + $0x25]]  ;;  %v1298_v54 = vld [vmem:[%s1966_s0 + $0x1b] sm:$0xff]  ;;  %v1309_v59 = vld [vmem:[%s1966_s0 + $0x23] sm:$0xff] }
   0xf   :  { %s1056_s29 = sld [smem:[#allocation2 + $0x3]] }
  0x10   :  { %s1057_s7 = sld [smem:[#allocation2 + $0xf]] }
  0x11   :  { %v86_v3 = vstv %s1048_s20  ;;  %s1058_s10 = sld [smem:[#allocation2 + $0x1b]] }
  0x12   :  { %v89_v4 = vmul.f32 %v86_v3, %v1187_v0  ;;  %v106_v5 = vstv %s1049_s21  ;;  %v87_v6 = vmul.f32 %v86_v3, %v1192_v1  ;;  %v88_v9 = vmul.f32 %v86_v3, %v1197_v2  ;;  %s1059_s11 = sld [smem:[#allocation2 + $0x27]] }
  0x13   :  { %v108_v7 = vmul.f32 %v106_v5, %v1197_v2  ;;  %v107_v8 = vmul.f32 %v106_v5, %v1192_v1  ;;  %v109_v10 = vmul.f32 %v106_v5, %v1187_v0  ;;  %v126_v11 = vstv %s1050_s27  ;;  %s1067_s12 = sld [smem:[#allocation2 + $0x5]] }
  0x14   :  { %97 = vrot.lane.b32.xlu1 %v89_v4, %s1155_s26  ;;  %93 = vrot.lane.b32.xlu0 %v87_v6, %s1155_s26  ;;  %v128_v12 = vmul.f32 %v126_v11, %v1197_v2  ;;  %v127_v13 = vmul.f32 %v126_v11, %v1192_v1  ;;  %v129_v14 = vmul.f32 %v126_v11, %v1187_v0  ;;  %v146_v15 = vstv %s1051_s28  ;;  %s1068_s13 = sld [smem:[#allocation2 + $0x11]]  ;;  %v1322_v4 = vld [vmem:[%s1966_s0 + $0x2b] sm:$0x1] }
  0x15   :  { %115 = vrot.lane.b32.xlu2 %v108_v7, %s1155_s26  ;;  %v148_v16 = vmul.f32 %v146_v15, %v1197_v2  ;;  %v147_v17 = vmul.f32 %v146_v15, %v1192_v1  ;;  %v149_v18 = vmul.f32 %v146_v15, %v1187_v0  ;;  %v201_v19 = vstv %s1056_s29  ;;  %s1069_s20 = sld [smem:[#allocation2 + $0x1d]] }
  0x16   :  { %v203_v23 = vmul.f32 %v201_v19, %v1226_v20  ;;  %v202_v24 = vmul.f32 %v201_v19, %v1231_v21  ;;  %v204_v25 = vmul.f32 %v201_v19, %v1236_v22  ;;  %v221_v26 = vstv %s1057_s7  ;;  %s1070_s21 = sld [smem:[#allocation2 + $0x29]] }
  0x17   :  { %v223_v27 = vmul.f32 %v221_v26, %v1226_v20  ;;  %v222_v28 = vmul.f32 %v221_v26, %v1231_v21  ;;  %v224_v29 = vmul.f32 %v221_v26, %v1236_v22  ;;  %v241_v30 = vstv %s1058_s10  ;;  %s1078_s22 = sld [smem:[#allocation2 + $0x7]] }
  0x18   :  { %v243_v31 = vmul.f32 %v241_v30, %v1226_v20  ;;  %v242_v32 = vmul.f32 %v241_v30, %v1231_v21  ;;  %v244_v33 = vmul.f32 %v241_v30, %v1236_v22  ;;  %v261_v34 = vstv %s1059_s11  ;;  %s1079_s23 = sld [smem:[#allocation2 + $0x13]] }
  0x19   :  { %v263_v35 = vmul.f32 %v261_v34, %v1226_v20  ;;  %v262_v36 = vmul.f32 %v261_v34, %v1231_v21  ;;  %v264_v37 = vmul.f32 %v261_v34, %v1236_v22  ;;  %v317_v40 = vstv %s1067_s12  ;;  %s1080_s29 = sld [smem:[#allocation2 + $0x1f]] }
  0x1a   :  { %v337_v41 = vstv %s1068_s13  ;;  %v319_v42 = vmul.f32 %v1270_v39, %v317_v40  ;;  %v318_v43 = vmul.f32 %v1265_v38, %v317_v40  ;;  %v320_v46 = vmul.f32 %v1281_v45, %v317_v40  ;;  %s53_s30 = sld [smem:[#allocation2]] }
  0x1b   :  { %v338_v44 = vmul.f32 %v1265_v38, %v337_v41  ;;  %v339_v47 = vmul.f32 %v1270_v39, %v337_v41  ;;  %v340_v48 = vmul.f32 %v1281_v45, %v337_v41  ;;  %v357_v49 = vstv %s1069_s20  ;;  %s42_s4 = sld [smem:[#allocation5]] }
  0x1c   :  { %113 = vrot.lane.b32.xlu1 %v107_v8, %s1155_s26  ;;  %95 = vrot.lane.b32.xlu0 %v88_v9, %s1155_s26  ;;  %v359_v50 = vmul.f32 %v1270_v39, %v357_v49  ;;  %v358_v51 = vmul.f32 %v1265_v38, %v357_v49  ;;  %v360_v52 = vmul.f32 %v1281_v45, %v357_v49  ;;  %v377_v53 = vstv %s1070_s21  ;;  %s1081_s5 = sld [smem:[#allocation2 + $0x2b]] }
  0x1d   :  { %117 = vrot.lane.b32.xlu2 %v109_v10, %s1155_s26  ;;  %v432_v55 = vstv %s1078_s22  ;;  %v379_v56 = vmul.f32 %v1270_v39, %v377_v53  ;;  %v378_v57 = vmul.f32 %v1265_v38, %v377_v53  ;;  %v380_v7 = vmul.f32 %v1281_v45, %v377_v53  ;;  %s1089_s6 = sld [smem:[#allocation2 + $0x9]] }
  0x1e   :  { %v433_v58 = vmul.f32 %v1298_v54, %v432_v55  ;;  %v452_v60 = vstv %s1079_s23  ;;  %v434_v63 = vmul.f32 %v1309_v59, %v432_v55  ;;  %v435_v6 = vmul.f32 %v1322_v4, %v432_v55  ;;  %s1052_s7 = sld [smem:[#allocation2 + $0x2]] }
  0x1f   :  { %v453_v62 = vmul.f32 %v1298_v54, %v452_v60  ;;  %v454_v3 = vmul.f32 %v1309_v59, %v452_v60  ;;  %v455_v8 = vmul.f32 %v1322_v4, %v452_v60  ;;  %v472_v9 = vstv %s1080_s29  ;;  %s1045_s8 = sld [smem:[#allocation2 + $0xc]] }
  0x20   :  { %v1334_v11 = vstv %s53_s30  ;;  %s1042_s9 = sld [smem:[#allocation5 + $0x1]] }
  0x21   :  { %v57_v15 = vmul.f32 %v1334_v11, %v1187_v0  ;;  %s1090_s10 = sld [smem:[#allocation2 + $0x15]] }
  0x22   :  { %s1046_s13 = sld [smem:[#allocation2 + $0x18]] }
  0x23   :  { %s1053_s14 = sld [smem:[#allocation2 + $0xe]] }
  0x24   :  { %135 = vrot.lane.b32.xlu1 %v128_v12, %s1155_s26  ;;  %133 = vrot.lane.b32.xlu0 %v127_v13, %s1155_s26  ;;  %v474_v12 = vmul.f32 %v1309_v59, %v472_v9  ;;  %v473_v13 = vmul.f32 %v1298_v54, %v472_v9  ;;  %s1043_s15 = sld [smem:[#allocation5 + $0x2]] }
  0x25   :  { %137 = vrot.lane.b32.xlu2 %v129_v14, %s1155_s26  ;;  %v475_v14 = vmul.f32 %v1322_v4, %v472_v9  ;;  %v1360_v30 = vstv %s1045_s8  ;;  %s1047_s18 = sld [smem:[#allocation2 + $0x24]] }
  0x26   :  { %s1054_s19 = sld [smem:[#allocation2 + $0x1a]] }
  0x27   :  { %s1044_s20 = sld [smem:[#allocation5 + $0x3]] }
  0x28   :  { %s1091_s23 = sld [smem:[#allocation2 + $0x21]] }
  0x29   :  { %s1055_s1 = sld [smem:[#allocation2 + $0x26]] }
  0x2a   :  { %s1092_s24 = sld [smem:[#allocation2 + $0x2d]] }
  0x2b   :  { %s1100_s2 = sld [smem:[#allocation2 + $0xb]] }
  0x2c   :  { %155 = vrot.lane.b32.xlu1 %v148_v16, %s1155_s26  ;;  %153 = vrot.lane.b32.xlu0 %v147_v17, %s1155_s26  ;;  %v1341_v16 = vstv %s42_s4  ;;  %v492_v17 = vstv %s1081_s5  ;;  %s1064_s25 = sld [smem:[#allocation2 + $0x10]] }
  0x2d   :  { %157 = vrot.lane.b32.xlu2 %v149_v18, %s1155_s26  ;;  %v60_v19 = vadd.f32 %v57_v15, %v1341_v16  ;;  %v495_v9 = vmul.f32 %v1322_v4, %v492_v17  ;;  %s1101_s27 = sld [smem:[#allocation2 + $0x17]] }
  0x2e   :  { %s1065_s5 = sld [smem:[#allocation2 + $0x1c]] }
  0x2f   :  { %s1102_s8 = sld [smem:[#allocation2 + $0x23]] }
  0x30   :  { %s1076_s11 = sld [smem:[#allocation2 + $0x1e]] }
  0x31   :  { %s1066_s12 = sld [smem:[#allocation2 + $0x28]] }
  0x32   :  { %s1087_s16 = sld [smem:[#allocation2 + $0x20]] }
  0x33   :  { %s1097_s17 = sld [smem:[#allocation2 + $0x16]] }
  0x34   :  { %210 = vrot.lane.b32.xlu1 %v203_v23, %s1155_s26  ;;  %208 = vrot.lane.b32.xlu0 %v202_v24, %s1155_s26  ;;  %v1352_v24 = vld [vmem:[%s1966_s0 + $0x30] sm:$0xff]  ;;  %s1714_s21 = sld [smem:[#allocation2 + $0x2e]] }
  0x35   :  { %212 = vrot.lane.b32.xlu2 %v204_v25, %s1155_s26  ;;  %v548_v25 = vstv %s1089_s6 }
  0x3c   :  { %230 = vrot.lane.b32.xlu1 %v223_v27, %s1155_s26  ;;  %228 = vrot.lane.b32.xlu0 %v222_v28, %s1155_s26  ;;  %v1356_v27 = vstv %s1052_s7  ;;  %v494_v28 = vmul.f32 %v1309_v59, %v492_v17 }
  0x3d   :  { %232 = vrot.lane.b32.xlu2 %v224_v29, %s1155_s26  ;;  %v493_v29 = vmul.f32 %v1298_v54, %v492_v17  ;;  %v172_v34 = vmul.f32 %v1356_v27, %v1236_v22 }
  0x44   :  { %250 = vrot.lane.b32.xlu1 %v243_v31, %s1155_s26  ;;  %248 = vrot.lane.b32.xlu0 %v242_v32, %s1155_s26  ;;  %v549_v31 = vmul.f32 %v1352_v24, %v548_v25  ;;  %v65_v32 = vmul.f32 %v1360_v30, %v1187_v0 }
  0x45   :  { %252 = vrot.lane.b32.xlu2 %v244_v33, %s1155_s26 }
  0x4c   :  { %270 = vrot.lane.b32.xlu1 %v263_v35, %s1155_s26  ;;  %268 = vrot.lane.b32.xlu0 %v262_v36, %s1155_s26  ;;  %v1369_v35 = vstv %s1042_s9  ;;  %v1375_v36 = vld [vmem:[%s1966_s0 + $0x38] sm:$0xff]  ;;  %s1103_s9 = sld [smem:[#allocation2 + $0x2f]] }
  0x4d   :  { %272 = vrot.lane.b32.xlu2 %v264_v37, %s1155_s26  ;;  %v568_v37 = vstv %s1090_s10  ;;  %v68_v40 = vadd.f32 %v65_v32, %v1369_v35  ;;  %v550_v49 = vmul.f32 %v1375_v36, %v548_v25  ;;  %v64_v32 = vmul.f32 %v1360_v30, %v1197_v2  ;;  %s1075_s10 = sld [smem:[#allocation2 + $0x12]] }
  0x54   :  { %326 = vrot.lane.b32.xlu1 %v319_v42, %s1155_s26  ;;  %324 = vrot.lane.b32.xlu0 %v318_v43, %s1155_s26 }
  0x55   :  { %344 = vrot.lane.b32.xlu2 %v338_v44, %s1155_s26  ;;  %v1380_v44 = vstv %s1046_s13  ;;  %s1085_s13 = sld [smem:[#allocation2 + $0x8]] }
  0x56   :  { %v73_v53 = vmul.f32 %v1380_v44, %v1187_v0 }
  0x5c   :  { %328 = vrot.lane.b32.xlu1 %v320_v46, %s1155_s26  ;;  %346 = vrot.lane.b32.xlu0 %v339_v47, %s1155_s26 }
  0x5d   :  { %348 = vrot.lane.b32.xlu2 %v340_v48, %s1155_s26  ;;  %v569_v48 = vmul.f32 %v1352_v24, %v568_v37 }
  0x64   :  { %366 = vrot.lane.b32.xlu1 %v359_v50, %s1155_s26  ;;  %364 = vrot.lane.b32.xlu0 %v358_v51, %s1155_s26  ;;  %v570_v50 = vmul.f32 %v1375_v36, %v568_v37  ;;  %v1387_v51 = vstv %s1053_s14  ;;  %s1096_s14 = sld [smem:[#allocation2 + $0xa]] }
  0x65   :  { %368 = vrot.lane.b32.xlu2 %v360_v52, %s1155_s26  ;;  %v180_v55 = vmul.f32 %v1387_v51, %v1236_v22 }
  0x6c   :  { %386 = vrot.lane.b32.xlu1 %v379_v56, %s1155_s26  ;;  %384 = vrot.lane.b32.xlu0 %v378_v57, %s1155_s26  ;;  %v1394_v56 = vstv %s1043_s15  ;;  %v1402_v57 = vld [vmem:[%s1966_s0 + $0x40] sm:$0x1]  ;;  %s1086_s15 = sld [smem:[#allocation2 + $0x14]] }
  0x6d   :  { %439 = vrot.lane.b32.xlu2 %v433_v58, %s1155_s26  ;;  %v76_v58 = vadd.f32 %v73_v53, %v1394_v56 }
  0x6f   :  { %v1311_v61 = vpop.permute.xlu2 %115 }
  0x74   :  { %459 = vrot.lane.b32.xlu1 %v453_v62, %s1155_s26  ;;  %441 = vrot.lane.b32.xlu0 %v434_v63, %s1155_s26 }
  0x75   :  { %461 = vrot.lane.b32.xlu2 %v454_v3, %s1155_s26  ;;  %v1409_v3 = vstv %s1047_s18  ;;  %s1077_s18 = sld [smem:[#allocation2 + $0x2a]] }
  0x77   :  { %v1324_v5 = vpop.permute.xlu2 %117 }
  0x78   :  { %v124_v52 = vadd.f32 %v1324_v5, %v68_v40 }
  0x7a   :  { %v183_v60 = vadd.f32 %v180_v55, %v124_v52  ;;  %v171_v52 = vmul.f32 %v1356_v27, %v1226_v20 }
  0x7c   :  { %443 = vrot.lane.b32.xlu1 %v435_v6, %s1155_s26  ;;  %388 = vrot.lane.b32.xlu0 %v380_v7, %s1155_s26  ;;  %v1411_v6 = vstv %s1054_s19  ;;  %s1672_s19 = sld [smem:[#allocation2 + $0x22]] }
  0x7d   :  { %463 = vrot.lane.b32.xlu2 %v455_v8, %s1155_s26  ;;  %v551_v8 = vmul.f32 %v1402_v57, %v548_v25  ;;  %v588_v25 = vstv %s1091_s23 }
  0x7f   :  { %v1332_v10 = vpop.permute.xlu2 %137 }
  0x80   :  { %v144_v15 = vadd.f32 %v1332_v10, %v76_v58 }
  0x84   :  { %481 = vrot.lane.b32.xlu1 %v474_v12, %s1155_s26  ;;  %479 = vrot.lane.b32.xlu0 %v473_v13, %s1155_s26  ;;  %v55_v12 = vmul.f32 %v1334_v11, %v1192_v1  ;;  %v56_v13 = vmul.f32 %v1334_v11, %v1197_v2 }
  0x85   :  { %483 = vrot.lane.b32.xlu2 %v475_v14, %s1155_s26  ;;  %v571_v14 = vmul.f32 %v1402_v57, %v568_v37  ;;  %v63_v37 = vmul.f32 %v1360_v30, %v1192_v1  ;;  %v67_v30 = vadd.f32 %v64_v32, %v1369_v35 }
  0x86   :  { %v98_v18 = vpop.permute.xlu1 %97  ;;  %v1347_v23 = vpop.permute.xlu0 %93  ;;  %v58_v17 = vadd.f32 %v55_v12, %v1341_v16  ;;  %v59_v11 = vadd.f32 %v56_v13, %v1341_v16  ;;  %v170_v16 = vmul.f32 %v1356_v27, %v1231_v21 }
  0x87   :  { %v1354_v26 = vpop.permute.xlu2 %157  ;;  %v104_v33 = vadd.f32 %v98_v18, %v60_v19  ;;  %v81_v18 = vmul.f32 %v1409_v3, %v1187_v0  ;;  %v188_v19 = vmul.f32 %v1411_v6, %v1236_v22 }
  0x89   :  { %v175_v41 = vadd.f32 %v172_v34, %v104_v33  ;;  %v191_v0 = vadd.f32 %v188_v19, %v144_v15  ;;  %v1441_v34 = vstv %s1055_s1  ;;  %v72_v15 = vmul.f32 %v1380_v44, %v1197_v2  ;;  %s1030_s1 = sshll.u32 %s1969_s3, 4  ;;  %s1031_s1 = int_to_ptr.hbm [resolvable:$true] %s1030_s1 }
  0x8a   :  { %v196_v55 = vmul.f32 %v1441_v34, %v1236_v22  ;;  %v1468_v22 = vld [vmem:[%s1966_s0 + $0x33] sm:$0xff] }
  0x8c   :  { %501 = vrot.lane.b32.xlu1 %v494_v28, %s1155_s26  ;;  %499 = vrot.lane.b32.xlu0 %v493_v29, %s1155_s26  ;;  %v1427_v28 = vstv %s1044_s20  ;;  %s1676_s20 = sld [smem:[#allocation2 + $0x2c]] }
  0x8d   :  { %555 = vrot.lane.b32.xlu2 %v549_v31, %s1155_s26  ;;  %v84_v10 = vadd.f32 %v81_v18, %v1427_v28 }
  0x8e   :  { %v1378_v42 = vpop.permute.xlu1 %113  ;;  %v96_v43 = vpop.permute.xlu0 %95 }
  0x8f   :  { %v213_v46 = vpop.permute.xlu2 %212  ;;  %v164_v53 = vadd.f32 %v1354_v26, %v84_v10  ;;  %v178_v10 = vmul.f32 %v1387_v51, %v1231_v21 }
  0x90   :  { %v1382_v47 = vadd.f32 %v213_v46, %v175_v41  ;;  %v590_v41 = vmul.f32 %v1375_v36, %v588_v25  ;;  %v589_v46 = vmul.f32 %v1352_v24, %v588_v25 }
  0x91   :  { %v199_v26 = vadd.f32 %v196_v55, %v164_v53  ;;  %v80_v53 = vmul.f32 %v1409_v3, %v1197_v2  ;;  %v79_v55 = vmul.f32 %v1409_v3, %v1192_v1  ;;  %v1532_v3 = vld [vmem:[%s1966_s0 + $0x43] sm:$0x1] }
  0x93   :  { %v82_v2 = vadd.f32 %v79_v55, %v1427_v28 }
  0x94   :  { %575 = vrot.lane.b32.xlu1 %v569_v48, %s1155_s26  ;;  %557 = vrot.lane.b32.xlu0 %v550_v49, %s1155_s26  ;;  %v102_v48 = vadd.f32 %v1347_v23, %v58_v17  ;;  %v103_v49 = vadd.f32 %v96_v43, %v59_v11  ;;  %v66_v23 = vadd.f32 %v63_v37, %v1369_v35  ;;  %v683_v37 = vstv %s1101_s27 }
  0x95   :  { %577 = vrot.lane.b32.xlu2 %v570_v50, %s1155_s26  ;;  %v591_v50 = vmul.f32 %v1402_v57, %v588_v25  ;;  %v71_v11 = vmul.f32 %v1380_v44, %v1192_v1  ;;  %v83_v1 = vadd.f32 %v80_v53, %v1427_v28  ;;  %v301_v28 = vstv %s1065_s5 }
  0x96   :  { %v1405_v62 = vpop.permute.xlu1 %135  ;;  %v1407_v63 = vpop.permute.xlu0 %133  ;;  %v174_v43 = vadd.f32 %v171_v52, %v103_v49  ;;  %v173_v58 = vadd.f32 %v170_v16, %v102_v48  ;;  %v186_v52 = vmul.f32 %v1411_v6, %v1231_v21  ;;  %v723_v53 = vstv %s1103_s9 }
  0x97   :  { %v233_v5 = vpop.permute.xlu2 %232  ;;  %v74_v16 = vadd.f32 %v71_v11, %v1394_v56 }
  0x98   :  { %v1413_v7 = vadd.f32 %v233_v5, %v183_v60  ;;  %v1463_v60 = vstv %s1092_s24 }
  0x99   :  { %v610_v19 = vmul.f32 %v1375_v36, %v1463_v60  ;;  %v609_v17 = vmul.f32 %v1352_v24, %v1463_v60 }
  0x9c   :  { %559 = vrot.lane.b32.xlu1 %v551_v8, %s1155_s26  ;;  %503 = vrot.lane.b32.xlu0 %v495_v9, %s1155_s26  ;;  %v663_v8 = vstv %s1100_s2  ;;  %v123_v9 = vadd.f32 %v1311_v61, %v67_v30  ;;  %v122_v61 = vadd.f32 %v1378_v42, %v66_v23  ;;  %v684_v30 = vmul.f32 %v1468_v22, %v683_v37 }
  0x9d   :  { %579 = vrot.lane.b32.xlu2 %v571_v14, %s1155_s26  ;;  %v179_v14 = vmul.f32 %v1387_v51, %v1226_v20  ;;  %v664_v25 = vmul.f32 %v1468_v22, %v663_v8  ;;  %v1503_v51 = vld [vmem:[%s1966_s0 + $0x3b] sm:$0xff]  ;;  %v666_v11 = vmul.f32 %v1532_v3, %v663_v8  ;;  %s1063_s0 = sld [smem:[#allocation2 + $0x4]] }
  0x9e   :  { %v1435_v29 = vpop.permute.xlu1 %155  ;;  %v1437_v31 = vpop.permute.xlu0 %153  ;;  %v181_v44 = vadd.f32 %v178_v10, %v122_v61  ;;  %v665_v23 = vmul.f32 %v1503_v51, %v663_v8  ;;  %v195_v10 = vmul.f32 %v1441_v34, %v1226_v20  ;;  %v703_v8 = vstv %s1102_s8 }
  0x9f   :  { %v253_v33 = vpop.permute.xlu2 %252  ;;  %v182_v32 = vadd.f32 %v179_v14, %v123_v9 }
  0xa0   :  { %v1447_v40 = vadd.f32 %v253_v33, %v191_v0  ;;  %v75_v0 = vadd.f32 %v72_v15, %v1394_v56  ;;  %v1494_v33 = vstv %s1064_s25  ;;  %v187_v56 = vmul.f32 %v1411_v6, %v1226_v20  ;;  %s1157_s25 = smov [#allocation7]  }
  0xa1   :  { %v294_v42 = vmul.f32 %v1265_v38, %v1494_v33  ;;  %v296_v6 = vmul.f32 %v1281_v45, %v1494_v33 }
  0xa3   :  { %v299_v9 = vadd.f32 %v296_v6, %v1413_v7  ;;  %v163_v7 = vadd.f32 %v1435_v29, %v83_v1  ;;  %v295_v6 = vmul.f32 %v1270_v39, %v1494_v33  ;;  %v1582_v1 = vstv %s1075_s10 }
  0xa4   :  { %597 = vrot.lane.b32.xlu1 %v590_v41, %s1155_s26  ;;  %595 = vrot.lane.b32.xlu0 %v589_v46, %s1155_s26 }
  0xa5   :  { %599 = vrot.lane.b32.xlu2 %v591_v50, %s1155_s26 }
  0xa6   :  { %v211_v27 = vpop.permute.xlu1 %210  ;;  %v209_v5 = vpop.permute.xlu0 %208 }
  0xa7   :  { %v273_v12 = vpop.permute.xlu2 %272  ;;  %v1471_v35 = vadd.f32 %v211_v27, %v174_v43  ;;  %v1473_v13 = vadd.f32 %v209_v5, %v173_v58  ;;  %v143_v43 = vadd.f32 %v1405_v62, %v75_v0  ;;  %v142_v58 = vadd.f32 %v1407_v63, %v74_v16 }
  0xa8   :  { %v1479_v18 = vadd.f32 %v273_v12, %v199_v26  ;;  %v685_v27 = vmul.f32 %v1503_v51, %v683_v37  ;;  %v162_v0 = vadd.f32 %v1437_v31, %v82_v2  ;;  %v194_v16 = vmul.f32 %v1441_v34, %v1231_v21 }
  0xa9   :  { %v190_v62 = vadd.f32 %v187_v56, %v143_v43  ;;  %v189_v63 = vadd.f32 %v186_v52, %v142_v58  ;;  %v705_v34 = vmul.f32 %v1503_v51, %v703_v8  ;;  %v706_v56 = vmul.f32 %v1532_v3, %v703_v8 }
  0xaa   :  { %v197_v20 = vadd.f32 %v194_v16, %v162_v0  ;;  %v725_v58 = vmul.f32 %v1503_v51, %v723_v53 }
  0xac   :  { %617 = vrot.lane.b32.xlu1 %v610_v19, %s1155_s26  ;;  %615 = vrot.lane.b32.xlu0 %v609_v17, %s1155_s26 }
  0xad   :  { %670 = vrot.lane.b32.xlu2 %v664_v25, %s1155_s26  ;;  %v611_v25 = vmul.f32 %v1402_v57, %v1463_v60  ;;  %v198_v60 = vadd.f32 %v195_v10, %v163_v7  ;;  %v411_v10 = vmul.f32 %v1322_v4, %v1582_v1 }
  0xae   :  { %v231_v41 = vpop.permute.xlu1 %230  ;;  %v229_v46 = vpop.permute.xlu0 %228 }
  0xaf   :  { %v345_v48 = vpop.permute.xlu2 %344  ;;  %v1505_v49 = vadd.f32 %v231_v41, %v182_v32  ;;  %v237_v50 = vadd.f32 %v229_v46, %v181_v44  ;;  %v686_v32 = vmul.f32 %v1532_v3, %v683_v37 }
  0xb1   :  { %v297_v26 = vadd.f32 %v294_v42, %v237_v50  ;;  %v304_v42 = vmul.f32 %v1281_v45, %v301_v28  ;;  %v1558_v50 = vstv %s1063_s0 }
  0xb2   :  { %v287_v52 = vmul.f32 %v1270_v39, %v1558_v50 }
  0xb3   :  { %v1522_v5 = vadd.f32 %v345_v48, %v297_v26  ;;  %v307_v29 = vadd.f32 %v304_v42, %v1447_v40  ;;  %v704_v48 = vmul.f32 %v1468_v22, %v703_v8  ;;  %v724_v26 = vmul.f32 %v1468_v22, %v723_v53 }
  0xb4   :  { %690 = vrot.lane.b32.xlu1 %v684_v30, %s1155_s26  ;;  %672 = vrot.lane.b32.xlu0 %v665_v23, %s1155_s26  ;;  %v290_v40 = vadd.f32 %v287_v52, %v1471_v35  ;;  %v726_v35 = vmul.f32 %v1532_v3, %v723_v53 }
  0xb5   :  { %692 = vrot.lane.b32.xlu2 %v685_v27, %s1155_s26  ;;  %v288_v27 = vmul.f32 %v1281_v45, %v1558_v50 }
  0xb6   :  { %v251_v12 = vpop.permute.xlu1 %250  ;;  %v249_v14 = vpop.permute.xlu0 %248 }
  0xb7   :  { %v349_v15 = vpop.permute.xlu2 %348  ;;  %v1535_v19 = vadd.f32 %v251_v12, %v190_v62  ;;  %v1537_v17 = vadd.f32 %v249_v14, %v189_v63  ;;  %v291_v2 = vadd.f32 %v288_v27, %v1382_v47  ;;  %v410_v62 = vmul.f32 %v1309_v59, %v1582_v1 }
  0xb8   :  { %v1539_v61 = vadd.f32 %v349_v15, %v299_v9  ;;  %v298_v63 = vadd.f32 %v295_v6, %v1505_v49  ;;  %v302_v47 = vmul.f32 %v1265_v38, %v301_v28 }
  0xba   :  { %v305_v0 = vadd.f32 %v302_v47, %v1537_v17 }
  0xbc   :  { %674 = vrot.lane.b32.xlu1 %v666_v11, %s1155_s26  ;;  %619 = vrot.lane.b32.xlu0 %v611_v25, %s1155_s26  ;;  %v303_v25 = vmul.f32 %v1270_v39, %v301_v28 }
  0xbd   :  { %694 = vrot.lane.b32.xlu2 %v686_v32, %s1155_s26  ;;  %v414_v32 = vadd.f32 %v411_v10, %v1539_v61 }
  0xbe   :  { %v271_v31 = vpop.permute.xlu1 %270  ;;  %v269_v44 = vpop.permute.xlu0 %268  ;;  %v306_v49 = vadd.f32 %v303_v25, %v1535_v19 }
  0xbf   :  { %v369_v37 = vpop.permute.xlu2 %368  ;;  %v278_v41 = vadd.f32 %v271_v31, %v198_v60  ;;  %v277_v46 = vadd.f32 %v269_v44, %v197_v20  ;;  %v309_v31 = vstv %s1066_s12 }
  0xc0   :  { %v375_v21 = vadd.f32 %v369_v37, %v307_v29  ;;  %v1604_v29 = vstv %s1076_s11  ;;  %v311_v44 = vmul.f32 %v1270_v39, %v309_v31  ;;  %v310_v19 = vmul.f32 %v1265_v38, %v309_v31 }
  0xc1   :  { %v419_v17 = vmul.f32 %v1322_v4, %v1604_v29  ;;  %v312_v27 = vmul.f32 %v1281_v45, %v309_v31 }
  0xc2   :  { %v314_v61 = vadd.f32 %v311_v44, %v278_v41  ;;  %v313_v37 = vadd.f32 %v310_v19, %v277_v46  ;;  %v286_v41 = vmul.f32 %v1265_v38, %v1558_v50 }
  0xc3   :  { %v315_v6 = vadd.f32 %v312_v27, %v1479_v18 }
  0xc4   :  { %712 = vrot.lane.b32.xlu1 %v705_v34, %s1155_s26  ;;  %710 = vrot.lane.b32.xlu0 %v704_v48, %s1155_s26  ;;  %v422_v34 = vadd.f32 %v419_v17, %v375_v21  ;;  %v409_v17 = vmul.f32 %v1298_v54, %v1582_v1 }
  0xc5   :  { %714 = vrot.lane.b32.xlu2 %v706_v56, %s1155_s26 }
  0xc6   :  { %v327_v55 = vpop.permute.xlu1 %326  ;;  %v1567_v30 = vpop.permute.xlu0 %324 }
  0xc7   :  { %v1569_v23 = vpop.permute.xlu2 %439  ;;  %v1571_v43 = vadd.f32 %v327_v55, %v290_v40 }
  0xcc   :  { %732 = vrot.lane.b32.xlu1 %v725_v58, %s1155_s26  ;;  %730 = vrot.lane.b32.xlu0 %v724_v26, %s1155_s26 }
  0xcd   :  { %734 = vrot.lane.b32.xlu2 %v726_v35, %s1155_s26  ;;  %s1074_s26 = sld [smem:[#allocation2 + $0x6]] }
  0xce   :  { %v329_v9 = vpop.permute.xlu1 %328  ;;  %v347_v12 = vpop.permute.xlu0 %346 }
  0xcf   :  { %v462_v33 = vpop.permute.xlu2 %461  ;;  %v1589_v14 = vadd.f32 %v329_v9, %v291_v2  ;;  %v354_v15 = vadd.f32 %v347_v12, %v298_v63  ;;  %v289_v63 = vadd.f32 %v286_v41, %v1473_v13 }
  0xd1   :  { %v413_v11 = vadd.f32 %v410_v62, %v354_v15  ;;  %v333_v45 = vadd.f32 %v1567_v30, %v289_v63  ;;  %v1645_v30 = vstv %s1096_s14 }
  0xd3   :  { %v1595_v7 = vadd.f32 %v462_v33, %v413_v11  ;;  %v400_v62 = vstv %s1074_s26  ;;  %v516_v33 = vstv %s1085_s13 }
  0xd4   :  { %v401_v9 = vmul.f32 %v1298_v54, %v400_v62  ;;  %v517_v15 = vmul.f32 %v1352_v24, %v516_v33  ;;  %v518_v1 = vmul.f32 %v1375_v36, %v516_v33  ;;  %v403_v41 = vmul.f32 %v1322_v4, %v400_v62 }
  0xd6   :  { %v367_v16 = vpop.permute.xlu1 %366  ;;  %v365_v42 = vpop.permute.xlu0 %364  ;;  %v404_v50 = vadd.f32 %v401_v9, %v333_v45 }
  0xd7   :  { %v464_v60 = vpop.permute.xlu2 %463  ;;  %v1600_v20 = vadd.f32 %v367_v16, %v306_v49  ;;  %v1602_v8 = vadd.f32 %v365_v42, %v305_v0  ;;  %v632_v0 = vmul.f32 %v1468_v22, %v1645_v30 }
  0xd8   :  { %v1606_v28 = vadd.f32 %v464_v60, %v414_v32  ;;  %v448_v11 = vadd.f32 %v1569_v23, %v404_v50 }
  0xda   :  { %v520_v10 = vadd.f32 %v517_v15, %v448_v11  ;;  %v639_v15 = vstv %s1097_s17 }
  0xde   :  { %v387_v48 = vpop.permute.xlu1 %386  ;;  %v385_v56 = vpop.permute.xlu0 %384 }
  0xdf   :  { %v484_v52 = vpop.permute.xlu2 %483  ;;  %v1612_v40 = vadd.f32 %v387_v48, %v314_v61  ;;  %v1614_v53 = vadd.f32 %v385_v56, %v313_v37  ;;  %v402_v61 = vmul.f32 %v1309_v59, %v400_v62  ;;  %v412_v48 = vadd.f32 %v409_v17, %v1522_v5 }
  0xe0   :  { %v1616_v55 = vadd.f32 %v484_v52, %v422_v34  ;;  %v524_v52 = vstv %s1086_s15  ;;  %v417_v17 = vmul.f32 %v1298_v54, %v1604_v29 }
  0xe1   :  { %v405_v56 = vadd.f32 %v402_v61, %v1571_v43  ;;  %v526_v45 = vmul.f32 %v1375_v36, %v524_v52  ;;  %v406_v43 = vadd.f32 %v403_v41, %v1589_v14 }
  0xe2   :  { %v420_v41 = vadd.f32 %v417_v17, %v1602_v8 }
  0xe3   :  { %v529_v14 = vadd.f32 %v526_v45, %v1595_v7  ;;  %v641_v7 = vmul.f32 %v1503_v51, %v639_v15  ;;  %v647_v45 = vstv %s1672_s19 }
  0xe6   :  { %v460_v58 = vpop.permute.xlu1 %459  ;;  %v442_v26 = vpop.permute.xlu0 %441 }
  0xe7   :  { %v556_v39 = vpop.permute.xlu2 %555  ;;  %v449_v27 = vadd.f32 %v442_v26, %v405_v56  ;;  %v532_v26 = vstv %s1087_s16 }
  0xe8   :  { %v564_v49 = vadd.f32 %v556_v39, %v520_v10  ;;  %v468_v39 = vadd.f32 %v460_v58, %v412_v48  ;;  %v527_v58 = vmul.f32 %v1402_v57, %v524_v52  ;;  %v640_v10 = vmul.f32 %v1468_v22, %v639_v15 }
  0xe9   :  { %v521_v50 = vadd.f32 %v518_v1, %v449_v27 }
  0xea   :  { %v635_v32 = vadd.f32 %v632_v0, %v564_v49  ;;  %v633_v49 = vmul.f32 %v1503_v51, %v1645_v30  ;;  %v424_v0 = vstv %s1077_s18 }
  0xeb   :  { %v426_v61 = vmul.f32 %v1309_v59, %v424_v0  ;;  %v427_v56 = vmul.f32 %v1322_v4, %v424_v0 }
  0xee   :  { %v1622_v46 = vpop.permute.xlu1 %443  ;;  %v389_v21 = vpop.permute.xlu0 %388 }
  0xef   :  { %v1624_v35 = vpop.permute.xlu2 %577  ;;  %v1626_v2 = vadd.f32 %v389_v21, %v315_v6  ;;  %v525_v6 = vmul.f32 %v1352_v24, %v524_v52  ;;  %v642_v52 = vmul.f32 %v1532_v3, %v639_v15 }
  0xf1   :  { %v528_v5 = vadd.f32 %v525_v6, %v468_v39 }
  0xf6   :  { %v1631_v12 = vpop.permute.xlu1 %481  ;;  %v1633_v18 = vpop.permute.xlu0 %479 }
  0xf7   :  { %v1635_v38 = vpop.permute.xlu2 %579  ;;  %v488_v8 = vadd.f32 %v1633_v18, %v420_v41 }
  0xfe   :  { %v1639_v25 = vpop.permute.xlu1 %501  ;;  %v1641_v13 = vpop.permute.xlu0 %499 }
  0xff   :  { %v1643_v47 = vpop.permute.xlu2 %599 }
 0x106   :  { %v576_v16 = vpop.permute.xlu1 %575  ;;  %v558_v42 = vpop.permute.xlu0 %557 }
 0x107   :  { %v671_v60 = vpop.permute.xlu2 %670  ;;  %v584_v62 = vadd.f32 %v576_v16, %v528_v5  ;;  %v565_v11 = vadd.f32 %v558_v42, %v521_v50  ;;  %v535_v16 = vmul.f32 %v1402_v57, %v532_v26  ;;  %v530_v42 = vadd.f32 %v527_v58, %v1606_v28 }
 0x108   :  { %v1649_v31 = vadd.f32 %v671_v60, %v635_v32  ;;  %v450_v32 = vadd.f32 %v1622_v46, %v406_v43  ;;  %v519_v60 = vmul.f32 %v1402_v57, %v516_v33  ;;  %v585_v33 = vadd.f32 %v1624_v35, %v529_v14 }
 0x109   :  { %v643_v48 = vadd.f32 %v640_v10, %v584_v62  ;;  %v636_v46 = vadd.f32 %v633_v49, %v565_v11  ;;  %v586_v27 = vadd.f32 %v1635_v38, %v530_v42  ;;  %v540_v5 = vstv %s1676_s20 }
 0x10a   :  { %v743_v23 = vsel %vm742_vm0, %v1649_v31, -inf  ;;  %v522_v6 = vadd.f32 %v519_v60, %v450_v32  ;;  %v634_v38 = vmul.f32 %v1532_v3, %v1645_v30  ;;  %v644_v15 = vadd.f32 %v641_v7, %v585_v33 }
 0x10b   :  { %744 = vmax.xlane.f32.xlu0 %v743_v23  ;;  %v418_v23 = vmul.f32 %v1309_v59, %v1604_v29  ;;  %v645_v62 = vadd.f32 %v642_v52, %v586_v27  ;;  %v425_v11 = vmul.f32 %v1298_v54, %v424_v0  ;;  %v650_v30 = vmul.f32 %v1532_v3, %v647_v45 }
 0x10c   :  { %v538_v49 = vadd.f32 %v535_v16, %v1616_v55  ;;  %v430_v32 = vadd.f32 %v427_v56, %v1626_v2  ;;  %v429_v14 = vadd.f32 %v426_v61, %v1612_v40  ;;  %v543_v17 = vmul.f32 %v1402_v57, %v540_v5 }
 0x10d   :  { %v421_v1 = vadd.f32 %v418_v23, %v1600_v20  ;;  %v534_v20 = vmul.f32 %v1375_v36, %v532_v26  ;;  %v428_v55 = vadd.f32 %v425_v11, %v1614_v53  ;;  %v649_v40 = vmul.f32 %v1503_v51, %v647_v45 }
 0x10e   :  { %v560_v44 = vpop.permute.xlu1 %559  ;;  %v1653_v19 = vpop.permute.xlu0 %503  ;;  %v648_v16 = vmul.f32 %v1468_v22, %v647_v45  ;;  %v509_v53 = vadd.f32 %v1639_v25, %v429_v14  ;;  %v541_v33 = vmul.f32 %v1352_v24, %v540_v5 }
 0x10f   :  { %v693_v21 = vpop.permute.xlu2 %692  ;;  %v566_v50 = vadd.f32 %v560_v44, %v522_v6  ;;  %v489_v58 = vadd.f32 %v1631_v12, %v421_v1  ;;  %v533_v44 = vmul.f32 %v1352_v24, %v532_v26  ;;  %v542_v12 = vmul.f32 %v1375_v36, %v540_v5 }
 0x110   :  { %v1717_v10 = vadd.f32 %v693_v21, %v644_v15  ;;  %v606_v21 = vadd.f32 %v1643_v47, %v538_v49  ;;  %v510_v0 = vadd.f32 %v1653_v19, %v430_v32 }
 0x111   :  { %v637_v18 = vadd.f32 %v634_v38, %v566_v50  ;;  %v537_v26 = vadd.f32 %v534_v20, %v489_v58  ;;  %v536_v36 = vadd.f32 %v533_v44, %v488_v8  ;;  %v545_v6 = vadd.f32 %v542_v12, %v509_v53 }
 0x112   :  { %v807_v2 = vsel %vm742_vm0, %v1717_v10, -inf  ;;  %v653_v7 = vadd.f32 %v650_v30, %v606_v21  ;;  %v546_v56 = vadd.f32 %v543_v17, %v510_v0  ;;  %v40_v30 = vlaneseq }
 0x114   :  { %v1775_v12 = vand.u32 127, %v40_v30 }
 0x116   :  { %v1658_v37 = vpop.permute.xlu1 %597  ;;  %v1660_v34 = vpop.permute.xlu0 %595 }
 0x117   :  { %v695_v35 = vpop.permute.xlu2 %694  ;;  %v605_v57 = vadd.f32 %v1658_v37, %v537_v26  ;;  %v604_v61 = vadd.f32 %v1660_v34, %v536_v36  ;;  %v655_v37 = vstv %s1714_s21 }
 0x118   :  { %v1723_v60 = vadd.f32 %v695_v35, %v645_v62  ;;  %v658_v34 = vmul.f32 %v1532_v3, %v655_v37  ;;  %v657_v5 = vmul.f32 %v1503_v51, %v655_v37  ;;  %v656_v3 = vmul.f32 %v1468_v22, %v655_v37 }
 0x119   :  { %v651_v27 = vadd.f32 %v648_v16, %v604_v61 }
 0x11a   :  { %v810_v47 = vsel %vm749_vm1, %v1723_v60, -inf }
 0x11e   :  { %v1667_v63 = vpop.permute.xlu1 %617  ;;  %v1669_v9 = vpop.permute.xlu0 %615 }
 0x11f   :  { %v625_v35 = vadd.f32 %v1667_v63, %v545_v6 }
 0x126   :  { %v691_v39 = vpop.permute.xlu1 %690  ;;  %v673_v29 = vpop.permute.xlu0 %672 }
 0x127   :  { %v1696_v28 = vadd.f32 %v691_v39, %v643_v48  ;;  %v1698_v59 = vadd.f32 %v673_v29, %v636_v46  ;;  %v508_v48 = vadd.f32 %v1641_v13, %v428_v55  ;;  %v715_v46 = vpop.permute.xlu2 %714  ;;  %v652_v29 = vadd.f32 %v649_v40, %v605_v57 }
 0x128   :  { %v1747_v52 = vadd.f32 %v715_v46, %v653_v7 }
 0x129   :  { %v804_v4 = vsel %vm742_vm0, %v1696_v28, -inf  ;;  %v746_v43 = vsel %vm742_vm0, %v1698_v59, -inf  ;;  %v544_v25 = vadd.f32 %v541_v33, %v508_v48 }
 0x12a   :  { %805 = vmax.xlane.f32.xlu2 %v804_v4  ;;  %747 = vmax.xlane.f32.xlu1 %v746_v43  ;;  %v879_v43 = vsel %vm749_vm1, %v1747_v52, -inf }
 0x12b   :  { %v624_v45 = vadd.f32 %v1669_v9, %v544_v25  ;;  %v660_v9 = vadd.f32 %v657_v5, %v625_v35 }
 0x12d   :  { %v659_v51 = vadd.f32 %v656_v3, %v624_v45 }
 0x12e   :  { %v675_v23 = vpop.permute.xlu1 %674  ;;  %v620_v54 = vpop.permute.xlu0 %619 }
 0x12f   :  { %v1729_v42 = vadd.f32 %v675_v23, %v637_v18  ;;  %v626_v39 = vadd.f32 %v620_v54, %v546_v56  ;;  %v735_v58 = vpop.permute.xlu2 %734 }
 0x131   :  { %v750_v19 = vsel %vm749_vm1, %v1729_v42, -inf  ;;  %v661_v50 = vadd.f32 %v658_v34, %v626_v39 }
 0x132   :  { %808 = vmax.xlane.f32.xlu2 %v807_v2  ;;  %811 = vmax.xlane.f32.xlu1 %v810_v47 }
 0x133   :  { %751 = vmax.xlane.f32.xlu0 %v750_v19  ;;  %v1763_v63 = vadd.f32 %v735_v58, %v661_v50 }
 0x135   :  { %v948_v44 = vsel %vm749_vm1, %v1763_v63, -inf }
 0x136   :  { %v713_v1 = vpop.permute.xlu1 %712  ;;  %v711_v13 = vpop.permute.xlu0 %710 }
 0x137   :  { %v1749_v41 = vadd.f32 %v713_v1, %v652_v29  ;;  %v1751_v24 = vadd.f32 %v711_v13, %v651_v27 }
 0x139   :  { %v873_v4 = vsel %vm742_vm0, %v1751_v24, -inf  ;;  %v876_v38 = vsel %vm742_vm0, %v1749_v41, -inf }
 0x13a   :  { %874 = vmax.xlane.f32.xlu2 %v873_v4  ;;  %880 = vmax.xlane.f32.xlu1 %v879_v43 }
 0x13b   :  { %877 = vmax.xlane.f32.xlu0 %v876_v38 }
 0x13e   :  { %v733_v15 = vpop.permute.xlu1 %732  ;;  %v731_v22 = vpop.permute.xlu0 %730 }
 0x13f   :  { %v1765_v20 = vadd.f32 %v733_v15, %v660_v9  ;;  %v1767_v8 = vadd.f32 %v731_v22, %v659_v51 }
 0x141   :  { %v942_v62 = vsel %vm742_vm0, %v1767_v8, -inf  ;;  %v945_v11 = vsel %vm742_vm0, %v1765_v20, -inf }
 0x142   :  { %943 = vmax.xlane.f32.xlu2 %v942_v62  ;;  %949 = vmax.xlane.f32.xlu1 %v948_v44 }
 0x143   :  { %946 = vmax.xlane.f32.xlu0 %v945_v11 }
 0x17e   :  { %v745_v49 = vpop.xlane.xlu0 %744 }
 0x17f   :  { %vm753_vm2 = vcmp.eq.f32.partialorder %v1649_v31, %v745_v49 }
 0x180   :  { %v756_v32 = vsel %vm753_vm2, %v1775_v12, 17 }
 0x181   :  { %v1780_v18 = vsel %vm742_vm0, %v756_v32, 2147483647 }
 0x182   :  { %v761_v14 = vshra.s32 %v1780_v18, 16  ;;  %v760_v44 = vand.u32 65535, %v1780_v18 }
 0x184   :  { %v1783_v26 = vcvt.s32.f32 %v761_v14  ;;  %v762_v30 = vcvt.s32.f32 %v760_v44 }
 0x186   :  { %764 = vmin.xlane.f32.xlu2 %v1783_v26 }
 0x19d   :  { %v806_v23 = vpop.xlane.xlu2 %805  ;;  %v748_v17 = vpop.xlane.xlu1 %747 }
 0x19e   :  { %vm813_vm3 = vcmp.eq.f32.partialorder %v1696_v28, %v806_v23  ;;  %vm754_vm4 = vcmp.eq.f32.partialorder %v1698_v59, %v748_v17 }
 0x19f   :  { %v816_v54 = vsel %vm813_vm3, %v1775_v12, 17  ;;  %v757_v31 = vsel %vm754_vm4, %v1775_v12, 17 }
 0x1a0   :  { %v1791_v21 = vsel %vm742_vm0, %v816_v54, 2147483647  ;;  %v1794_v0 = vsel %vm742_vm0, %v757_v31, 2147483647 }
 0x1a1   :  { %v821_v36 = vshra.s32 %v1791_v21, 16  ;;  %v776_v55 = vshra.s32 %v1794_v0, 16  ;;  %v820_v49 = vand.u32 65535, %v1791_v21  ;;  %v775_v32 = vand.u32 65535, %v1794_v0 }
 0x1a3   :  { %v1798_v2 = vcvt.s32.f32 %v821_v36  ;;  %v1800_v40 = vcvt.s32.f32 %v776_v55  ;;  %v822_v17 = vcvt.s32.f32 %v820_v49  ;;  %v777_v54 = vcvt.s32.f32 %v775_v32 }
 0x1a5   :  { %v809_v28 = vpop.xlane.xlu2 %808  ;;  %v812_v59 = vpop.xlane.xlu1 %811  ;;  %824 = vmin.xlane.f32.xlu1 %v1798_v2  ;;  %779 = vmin.xlane.f32.xlu0 %v1800_v40 }
 0x1a6   :  { %vm814_vm5 = vcmp.eq.f32.partialorder %v1717_v10, %v809_v28  ;;  %vm815_vm6 = vcmp.eq.f32.partialorder %v1723_v60, %v812_v59  ;;  %v752_v16 = vpop.xlane.xlu0 %751 }
 0x1a7   :  { %v817_v57 = vsel %vm814_vm5, %v1775_v12, 17  ;;  %v818_v61 = vsel %vm815_vm6, %v1775_v12, 17  ;;  %vm755_vm7 = vcmp.eq.f32.partialorder %v1729_v42, %v752_v16 }
 0x1a8   :  { %v1810_v47 = vsel %vm742_vm0, %v817_v57, 2147483647  ;;  %v1813_v19 = vsel %vm749_vm1, %v818_v61, 2147483647  ;;  %v758_v53 = vsel %vm755_vm7, %v1775_v12, 17 }
 0x1a9   :  { %v1817_v48 = vsel %vm749_vm1, %v758_v53, 2147483647  ;;  %v851_v10 = vshra.s32 %v1813_v19, 16  ;;  %v836_v60 = vshra.s32 %v1810_v47, 16  ;;  %v850_v31 = vand.u32 65535, %v1813_v19 }
 0x1aa   :  { %v791_v46 = vshra.s32 %v1817_v48, 16  ;;  %v835_v21 = vand.u32 65535, %v1810_v47  ;;  %v790_v0 = vand.u32 65535, %v1817_v48 }
 0x1ab   :  { %v1822_v33 = vcvt.s32.f32 %v851_v10  ;;  %v1824_v42 = vcvt.s32.f32 %v836_v60  ;;  %v852_v28 = vcvt.s32.f32 %v850_v31 }
 0x1ac   :  { %v1826_v7 = vcvt.s32.f32 %v791_v46  ;;  %v837_v59 = vcvt.s32.f32 %v835_v21 }
 0x1ad   :  { %v875_v56 = vpop.xlane.xlu2 %874  ;;  %v881_v37 = vpop.xlane.xlu1 %880  ;;  %854 = vmin.xlane.f32.xlu1 %v1822_v33  ;;  %839 = vmin.xlane.f32.xlu2 %v1824_v42 }
 0x1ae   :  { %vm882_vm8 = vcmp.eq.f32.partialorder %v1751_v24, %v875_v56  ;;  %vm884_vm9 = vcmp.eq.f32.partialorder %v1747_v52, %v881_v37  ;;  %v878_v34 = vpop.xlane.xlu0 %877  ;;  %794 = vmin.xlane.f32.xlu0 %v1826_v7 }
 0x1af   :  { %v885_v39 = vsel %vm882_vm8, %v1775_v12, 17  ;;  %v887_v29 = vsel %vm884_vm9, %v1775_v12, 17  ;;  %vm883_vm10 = vcmp.eq.f32.partialorder %v1749_v41, %v878_v34 }
 0x1b0   :  { %v1837_v27 = vsel %vm742_vm0, %v885_v39, 2147483647  ;;  %v1840_v6 = vsel %vm749_vm1, %v887_v29, 2147483647  ;;  %v886_v25 = vsel %vm883_vm10, %v1775_v12, 17 }
 0x1b1   :  { %v1844_v1 = vsel %vm742_vm0, %v886_v25, 2147483647  ;;  %v920_v52 = vshra.s32 %v1840_v6, 16  ;;  %v890_v13 = vshra.s32 %v1837_v27, 16  ;;  %v919_v47 = vand.u32 65535, %v1840_v6 }
 0x1b2   :  { %v905_v24 = vshra.s32 %v1844_v1, 16  ;;  %v889_v19 = vand.u32 65535, %v1837_v27  ;;  %v904_v53 = vand.u32 65535, %v1844_v1 }
 0x1b3   :  { %v1849_v35 = vcvt.s32.f32 %v920_v52  ;;  %v1851_v41 = vcvt.s32.f32 %v890_v13  ;;  %v921_v60 = vcvt.s32.f32 %v919_v47 }
 0x1b4   :  { %v1853_v45 = vcvt.s32.f32 %v905_v24  ;;  %v891_v46 = vcvt.s32.f32 %v889_v19 }
 0x1b5   :  { %v944_v5 = vpop.xlane.xlu2 %943  ;;  %v950_v3 = vpop.xlane.xlu1 %949  ;;  %923 = vmin.xlane.f32.xlu1 %v1849_v35  ;;  %893 = vmin.xlane.f32.xlu2 %v1851_v41 }
 0x1b6   :  { %vm951_vm11 = vcmp.eq.f32.partialorder %v1767_v8, %v944_v5  ;;  %vm953_vm12 = vcmp.eq.f32.partialorder %v1763_v63, %v950_v3  ;;  %v947_v50 = vpop.xlane.xlu0 %946  ;;  %908 = vmin.xlane.f32.xlu0 %v1853_v45 }
 0x1b7   :  { %v954_v4 = vsel %vm951_vm11, %v1775_v12, 17  ;;  %v956_v43 = vsel %vm953_vm12, %v1775_v12, 17  ;;  %vm952_vm13 = vcmp.eq.f32.partialorder %v1765_v20, %v947_v50 }
 0x1b8   :  { %v1864_v38 = vsel %vm742_vm0, %v954_v4, 2147483647  ;;  %v1867_v58 = vsel %vm749_vm1, %v956_v43, 2147483647  ;;  %v955_v9 = vsel %vm952_vm13, %v1775_v12, 17 }
 0x1b9   :  { %v1871_v51 = vsel %vm742_vm0, %v955_v9, 2147483647  ;;  %v989_v63 = vshra.s32 %v1867_v58, 16  ;;  %v959_v15 = vshra.s32 %v1864_v38, 16  ;;  %v988_v34 = vand.u32 65535, %v1867_v58 }
 0x1ba   :  { %v974_v22 = vshra.s32 %v1871_v51, 16  ;;  %v958_v39 = vand.u32 65535, %v1864_v38  ;;  %v973_v29 = vand.u32 65535, %v1871_v51 }
 0x1bb   :  { %v1876_v8 = vcvt.s32.f32 %v989_v63  ;;  %v1878_v20 = vcvt.s32.f32 %v959_v15  ;;  %v990_v25 = vcvt.s32.f32 %v988_v34 }
 0x1bc   :  { %v1880_v62 = vcvt.s32.f32 %v974_v22  ;;  %v960_v1 = vcvt.s32.f32 %v958_v39  ;;  %v975_v13 = vcvt.s32.f32 %v973_v29 }
 0x1bd   :  { %992 = vmin.xlane.f32.xlu1 %v1876_v8  ;;  %962 = vmin.xlane.f32.xlu2 %v1878_v20 }
 0x1be   :  { %977 = vmin.xlane.f32.xlu0 %v1880_v62 }
 0x1f9   :  { %v1886_v11 = vpop.xlane.xlu2 %764 }
 0x1fa   :  { %vm766_vm14 = vcmp.eq.f32.partialorder %v1783_v26, %v1886_v11  ;;  %v771_v5 = vcvt.f32.s32 %v1886_v11 }
 0x1fb   :  { %v767_v12 = vsel %vm766_vm14, %v762_v30, inf }
 0x1fc   :  { %768 = vmin.xlane.f32.xlu2 %v767_v12  ;;  %v772_v38 = vshll.u32 %v771_v5, 16 }
 0x218   :  { %v1892_v14 = vpop.xlane.xlu1 %824  ;;  %v1894_v23 = vpop.xlane.xlu0 %779 }
 0x219   :  { %vm826_vm15 = vcmp.eq.f32.partialorder %v1798_v2, %v1892_v14  ;;  %vm781_vm0 = vcmp.eq.f32.partialorder %v1800_v40, %v1894_v23  ;;  %v792_v40 = vcvt.s32.f32 %v790_v0  ;;  %v831_v3 = vcvt.f32.s32 %v1892_v14 }
 0x21a   :  { %v827_v18 = vsel %vm826_vm15, %v822_v17, inf  ;;  %v782_v26 = vsel %vm781_vm0, %v777_v54, inf  ;;  %v786_v15 = vcvt.f32.s32 %v1894_v23 }
 0x21b   :  { %828 = vmin.xlane.f32.xlu1 %v827_v18  ;;  %783 = vmin.xlane.f32.xlu0 %v782_v26  ;;  %v832_v58 = vshll.u32 %v831_v3, 16 }
 0x21c   :  { %v787_v11 = vshll.u32 %v786_v15, 16 }
 0x220   :  { %v1903_v36 = vpop.xlane.xlu1 %854  ;;  %v1905_v55 = vpop.xlane.xlu2 %839 }
 0x221   :  { %v1907_v2 = vpop.xlane.xlu0 %794  ;;  %vm856_vm1 = vcmp.eq.f32.partialorder %v1822_v33, %v1903_v36  ;;  %vm841_vm2 = vcmp.eq.f32.partialorder %v1824_v42, %v1905_v55  ;;  %v906_v42 = vcvt.s32.f32 %v904_v53  ;;  %v861_v22 = vcvt.f32.s32 %v1903_v36 }
 0x222   :  { %v857_v16 = vsel %vm856_vm1, %v852_v28, inf  ;;  %vm796_vm3 = vcmp.eq.f32.partialorder %v1826_v7, %v1907_v2  ;;  %v842_v57 = vsel %vm841_vm2, %v837_v59, inf }
 0x223   :  { %858 = vmin.xlane.f32.xlu1 %v857_v16  ;;  %v797_v61 = vsel %vm796_vm3, %v792_v40, inf  ;;  %843 = vmin.xlane.f32.xlu2 %v842_v57  ;;  %v862_v49 = vshll.u32 %v861_v22, 16  ;;  %vm1011_vm3 = vcmask 1040384  }
 0x224   :  { %798 = vmin.xlane.f32.xlu0 %v797_v61 }
 0x228   :  { %v1918_v48 = vpop.xlane.xlu1 %923  ;;  %v1920_v10 = vpop.xlane.xlu2 %893 }
 0x229   :  { %v1922_v33 = vpop.xlane.xlu0 %908  ;;  %vm925_vm4 = vcmp.eq.f32.partialorder %v1849_v35, %v1918_v48  ;;  %vm895_vm5 = vcmp.eq.f32.partialorder %v1851_v41, %v1920_v10  ;;  %v930_v0 = vcvt.f32.s32 %v1918_v48 }
 0x22a   :  { %v926_v7 = vsel %vm925_vm4, %v921_v60, inf  ;;  %vm910_vm6 = vcmp.eq.f32.partialorder %v1853_v45, %v1922_v33  ;;  %v896_v56 = vsel %vm895_vm5, %v891_v46, inf  ;;  %v915_v28 = vcvt.f32.s32 %v1922_v33 }
 0x22b   :  { %927 = vmin.xlane.f32.xlu1 %v926_v7  ;;  %v911_v37 = vsel %vm910_vm6, %v906_v42, inf  ;;  %897 = vmin.xlane.f32.xlu2 %v896_v56  ;;  %v931_v40 = vshll.u32 %v930_v0, 16  ;;  %v1156_v56 = vmov 0  }
 0x22c   :  { %912 = vmin.xlane.f32.xlu0 %v911_v37  ;;  %v916_v60 = vshll.u32 %v915_v28, 16 }
 0x230   :  { %v1933_v27 = vpop.xlane.xlu1 %992  ;;  %v1935_v6 = vpop.xlane.xlu2 %962 }
 0x231   :  { %v1937_v52 = vpop.xlane.xlu0 %977  ;;  %vm994_vm7 = vcmp.eq.f32.partialorder %v1876_v8, %v1933_v27  ;;  %vm964_vm8 = vcmp.eq.f32.partialorder %v1878_v20, %v1935_v6  ;;  %v846_v8 = vcvt.f32.s32 %v1905_v55  ;;  %v801_v20 = vcvt.f32.s32 %v1907_v2 }
 0x232   :  { %v995_v24 = vsel %vm994_vm7, %v990_v25, inf  ;;  %vm979_vm9 = vcmp.eq.f32.partialorder %v1880_v62, %v1937_v52  ;;  %v965_v35 = vsel %vm964_vm8, %v960_v1, inf  ;;  %v900_v55 = vcvt.f32.s32 %v1920_v10 }
 0x233   :  { %996 = vmin.xlane.f32.xlu1 %v995_v24  ;;  %v980_v41 = vsel %vm979_vm9, %v975_v13, inf  ;;  %966 = vmin.xlane.f32.xlu2 %v965_v35  ;;  %v847_v32 = vshll.u32 %v846_v8, 16  ;;  %v802_v18 = vshll.u32 %v801_v20, 16  ;;  %v999_v46 = vcvt.f32.s32 %v1933_v27 }
 0x234   :  { %981 = vmin.xlane.f32.xlu0 %v980_v41  ;;  %v901_v61 = vshll.u32 %v900_v55, 16  ;;  %v984_v33 = vcvt.f32.s32 %v1937_v52  ;;  %v969_v7 = vcvt.f32.s32 %v1935_v6 }
 0x235   :  { %v1000_v6 = vshll.u32 %v999_v46, 16 }
 0x26f   :  { %v769_v45 = vpop.xlane.xlu2 %768 }
 0x270   :  { %v770_v50 = vcvt.f32.s32 %v769_v45  ;;  %v970_v45 = vshll.u32 %v969_v7, 16 }
 0x272   :  { %v773_v51 = vadd.s32 %v772_v38, %v770_v50 }
 0x28e   :  { %v829_v4 = vpop.xlane.xlu1 %828  ;;  %v784_v43 = vpop.xlane.xlu0 %783 }
 0x28f   :  { %v830_v9 = vcvt.f32.s32 %v829_v4  ;;  %v785_v44 = vcvt.f32.s32 %v784_v43  ;;  %v985_v4 = vshll.u32 %v984_v33, 16 }
 0x291   :  { %v833_v63 = vadd.s32 %v832_v58, %v830_v9  ;;  %v788_v26 = vadd.s32 %v787_v11, %v785_v44 }
 0x293   :  { %vm864_vm10 = vcmp.lt.s32.totalorder %v833_v63, %v773_v51 }
 0x294   :  { %v870_v62 = vsel %vm864_vm10, %v833_v63, %v773_v51  ;;  %v867_v37 = vsel %vm864_vm10, 1, %v1156_v56 }
 0x296   :  { %v859_v30 = vpop.xlane.xlu1 %858  ;;  %v844_v12 = vpop.xlane.xlu2 %843 }
 0x297   :  { %v860_v14 = vcvt.f32.s32 %v859_v30  ;;  %v799_v17 = vpop.xlane.xlu0 %798  ;;  %v845_v54 = vcvt.f32.s32 %v844_v12 }
 0x298   :  { %v800_v23 = vcvt.f32.s32 %v799_v17 }
 0x299   :  { %v863_v31 = vadd.s32 %v862_v49, %v860_v14  ;;  %v848_v21 = vadd.s32 %v847_v32, %v845_v54 }
 0x29a   :  { %v803_v36 = vadd.s32 %v802_v18, %v800_v23 }
 0x29b   :  { %vm865_vm11 = vcmp.lt.s32.totalorder %v848_v21, %v788_v26 }
 0x29c   :  { %vm866_vm12 = vcmp.lt.s32.totalorder %v863_v31, %v803_v36  ;;  %v871_v59 = vsel %vm865_vm11, %v848_v21, %v788_v26  ;;  %v868_v29 = vsel %vm865_vm11, 1, %v1156_v56 }
 0x29d   :  { %v872_v2 = vsel %vm866_vm12, %v863_v31, %v803_v36  ;;  %v869_v39 = vsel %vm866_vm12, 1, %v1156_v56 }
 0x29e   :  { %v928_v16 = vpop.xlane.xlu1 %927  ;;  %v898_v57 = vpop.xlane.xlu2 %897 }
 0x29f   :  { %v929_v47 = vcvt.f32.s32 %v928_v16  ;;  %v913_v19 = vpop.xlane.xlu0 %912  ;;  %v899_v53 = vcvt.f32.s32 %v898_v57 }
 0x2a0   :  { %v914_v48 = vcvt.f32.s32 %v913_v19 }
 0x2a1   :  { %v932_v10 = vadd.s32 %v931_v40, %v929_v47  ;;  %v902_v42 = vadd.s32 %v901_v61, %v899_v53 }
 0x2a2   :  { %v917_v34 = vadd.s32 %v916_v60, %v914_v48 }
 0x2a3   :  { %vm935_vm13 = vcmp.lt.s32.totalorder %v932_v10, %v872_v2  ;;  %vm933_vm14 = vcmp.lt.s32.totalorder %v902_v42, %v870_v62 }
 0x2a4   :  { %v938_v25 = vsel %vm935_vm13, 2, %v869_v39  ;;  %vm934_vm15 = vcmp.lt.s32.totalorder %v917_v34, %v871_v59  ;;  %v936_v1 = vsel %vm933_vm14, 2, %v867_v37  ;;  %v941_v27 = vsel %vm935_vm13, %v932_v10, %v872_v2 }
 0x2a5   :  { %v937_v13 = vsel %vm934_vm15, 2, %v868_v29  ;;  %v940_v24 = vsel %vm934_vm15, %v917_v34, %v871_v59  ;;  %v939_v35 = vsel %vm933_vm14, %v902_v42, %v870_v62 }
 0x2a6   :  { %v997_v52 = vpop.xlane.xlu1 %996  ;;  %v967_v41 = vpop.xlane.xlu2 %966 }
 0x2a7   :  { %v998_v5 = vcvt.f32.s32 %v997_v52  ;;  %v982_v3 = vpop.xlane.xlu0 %981  ;;  %v968_v50 = vcvt.f32.s32 %v967_v41 }
 0x2a8   :  { %v983_v43 = vcvt.f32.s32 %v982_v3 }
 0x2a9   :  { %v1001_v38 = vadd.s32 %v1000_v6, %v998_v5  ;;  %v971_v58 = vadd.s32 %v970_v45, %v968_v50 }
 0x2aa   :  { %v986_v9 = vadd.s32 %v985_v4, %v983_v43 }
 0x2ab   :  { %vm1004_vm0 = vcmp.lt.s32.totalorder %v1001_v38, %v941_v27  ;;  %vm1002_vm1 = vcmp.lt.s32.totalorder %v971_v58, %v939_v35 }
 0x2ac   :  { %v1007_v51 = vsel %vm1004_vm0, 3, %v938_v25  ;;  %vm1003_vm2 = vcmp.lt.s32.totalorder %v986_v9, %v940_v24  ;;  %v1005_v63 = vsel %vm1002_vm1, 3, %v936_v1 }
 0x2ad   :  { %v1010_v15 = vmul.u32 21821, %v1007_v51  ;;  %v1006_v22 = vsel %vm1003_vm2, 3, %v937_v13  ;;  %v1008_v8 = vmul.u32 21821, %v1005_v63 }
 0x2ae   :  { %v1009_v20 = vmul.u32 21821, %v1006_v22 }
 0x2af   :  { %v1012_v62 = vsel %vm1011_vm3, %v1010_v15, 0 }
 0x2b0   :  { %v1013_v44 = vadd.s32 %v1009_v20, %v1008_v8 }
 0x2b2   :  { %v1014_v11 = vadd.s32 %v1013_v44, %v1012_v62 }
 0x2b4   :  { %v1015_v30 = vrot.slane %v1014_v11, 4 }
 0x2b6   :  { %v1016_v12 = vadd.s32 %v1015_v30, %v1014_v11 }
 0x2b8   :  { %v1017_v49 = vrot.slane %v1016_v12, 2 }
 0x2ba   :  { %v1018_v32 = vadd.s32 %v1017_v49, %v1016_v12 }
 0x2bc   :  { %v1019_v14 = vrot.slane %v1018_v32, 1 }
 0x2be   :  { %v1020_v17 = vadd.s32 %v1019_v14, %v1018_v32 }
 0x2c0   :  { %1104 = vpush %v1020_v17 }
 0x2f1   :  { %s1105_s24 = spop %1104 }
 0x2f2   :  { %s1022_s2 = scvt.s32.f32 %s1105_s24 }
 0x2f4   :  { %1024 = sst [smem:[#allocation7]] %s1022_s2 }
 0x2f5   :  { %1033 = dma.smem_to_hbm %s1157_s25, 16, %s1031_s1, [#allocation3]  }
 0x2f6   :  { %1151 = dma.done.wait [#allocation3], 16  }
 0x2f7   :  { %1152 = vsyncadd [#allocation3], 4294967280 }
 0x2f8   :  { %1038 = sfence }
 0x2f9   :  { %1039 = vsyncpa [#allocation3], 1 }
 0x2fa   :  { %1040 = vsyncpa [#allocation4], 1 }
 0x2fb   :  { %1041 = vsyncpa [#allocation6], 1 }

</bundles_post_ra>
